<compile_context>
chip_gen: v7x
topology: tpu7x:2x2x1
jax: 0.10.0
libtpu: 0.0.40
codegen_flags: <defaults>
</compile_context>

<pallas_src>
import functools

import jax
import jax.numpy as jnp
from jax.experimental import pallas as pl
from jax.experimental.pallas import tpu as pltpu

EPS_BN = 1e-5
EPS_NORM = 1e-12
C_FEAT = 2048  # fixed by the module (BatchNorm1d(2048), Linear(2048, nID))


def _pick_tile(total, candidates):
    """Largest candidate that evenly divides `total`, else the full extent."""
    for c in candidates:
        if total % c == 0:
            return c
    return total


# ---------------------------------------------------------------------------
# Kernel 1: global average pool (the only op touching the big tensor).
#   x block: (TN, TC, THW)  ->  gf block: (TN, TC) f32
# ---------------------------------------------------------------------------
def _gap_kernel(x_ref, gf_ref, acc_ref, *, inv_hw):
    hw_i = pl.program_id(2)

    @pl.when(hw_i == 0)
    def _():
        acc_ref[...] = jnp.zeros_like(acc_ref)

    # Lane-axis (HW) partial sum, accumulated in f32.
    acc_ref[...] += jnp.sum(x_ref[...].astype(jnp.float32), axis=-1)

    @pl.when(hw_i == pl.num_programs(2) - 1)
    def _():
        gf_ref[...] = (acc_ref[...] * inv_hw).astype(gf_ref.dtype)


def global_avg_pool(features):
    """NCHW (any float dtype) -> (N, 2048) f32 via a gridded Pallas kernel."""
    n, c, h, w = features.shape
    assert c == C_FEAT, f"BNneckLinear expects C={C_FEAT}, got {c}"
    hw = h * w
    x = features.reshape(n, c, hw)  # free view: no transpose, no extra HBM pass

    tn = _pick_tile(n, (16, 8))           # leading dim (unconstrained) / gf sublane
    tc = _pick_tile(c, (256,))            # sublane dim of x block, lane dim of gf
    thw = _pick_tile(hw, (512, 256, 128)) # lane dim of x block (full HW if ragged)

    grid = (n // tn, c // tc, hw // thw)
    return pl.pallas_call(
        functools.partial(_gap_kernel, inv_hw=1.0 / float(hw)),
        out_shape=jax.ShapeDtypeStruct((n, c), jnp.float32),
        grid_spec=pltpu.PrefetchScalarGridSpec(
            num_scalar_prefetch=0,
            grid=grid,
            in_specs=[pl.BlockSpec((tn, tc, thw), lambda i, j, k: (i, j, k))],
            out_specs=pl.BlockSpec((tn, tc), lambda i, j, k: (i, j)),
            scratch_shapes=[pltpu.VMEM((tn, tc), jnp.float32)],
        ),
        compiler_params=pltpu.CompilerParams(
            dimension_semantics=("parallel", "parallel", "arbitrary"),
            vmem_limit_bytes=48 * 1024 * 1024,
        ),
    )(x)


# ---------------------------------------------------------------------------
# Kernel 2 (training): BatchNorm1d (batch stats) + classifier, tiled over nID.
#   gf stays fully resident (same block every step); W tile is (TNID, 2048).
# ---------------------------------------------------------------------------
def _bn_classifier_kernel(gf_ref, gamma_ref, beta_ref, w_ref, logit_ref, *, mm_dtype):
    gf = gf_ref[...]                                        # (N, 2048) f32
    mu = jnp.mean(gf, axis=0, keepdims=True)
    d = gf - mu
    var = jnp.mean(d * d, axis=0, keepdims=True)            # biased (training BN)
    bn = d * jax.lax.rsqrt(var + EPS_BN) * gamma_ref[...] + beta_ref[...]
    # logits tile = bn @ W_tile^T : contract the 2048 axis of both operands
    # directly (no transposed copy of W); bf16 operands, f32 accumulation.
    logit_ref[...] = jax.lax.dot_general(
        bn.astype(mm_dtype),
        w_ref[...].astype(mm_dtype),
        dimension_numbers=(((1,), (1,)), ((), ())),
        preferred_element_type=jnp.float32,
    ).astype(logit_ref.dtype)


def bnneck_linear_train(features, bn_gamma, bn_beta, cls_weight, *,
                        use_bf16_matmul=True):
    """Training-mode forward. features: NCHW. Returns (global_features, logits)."""
    gf = global_avg_pool(features)                          # (N, 2048) f32
    n = gf.shape[0]
    n_id = cls_weight.shape[0]

    # Pad nID up to a multiple of 128 so the logits output is lane-dense
    # (unmasked vst); the zero-padded columns are sliced off afterwards.
    n_id_pad = max(128, ((n_id + 127) // 128) * 128)
    w = cls_weight
    if n_id_pad != n_id:
        w = jnp.pad(w, ((0, n_id_pad - n_id), (0, 0)))

    tnid = _pick_tile(n_id_pad, (512, 256, 128))
    mm_dtype = jnp.bfloat16 if use_bf16_matmul else jnp.float32

    logits_pad = pl.pallas_call(
        functools.partial(_bn_classifier_kernel, mm_dtype=mm_dtype),
        out_shape=jax.ShapeDtypeStruct((n, n_id_pad), jnp.float32),
        grid_spec=pltpu.PrefetchScalarGridSpec(
            num_scalar_prefetch=0,
            grid=(n_id_pad // tnid,),
            in_specs=[
                pl.BlockSpec((n, C_FEAT), lambda j: (0, 0)),     # gf (resident)
                pl.BlockSpec((1, C_FEAT), lambda j: (0, 0)),     # gamma
                pl.BlockSpec((1, C_FEAT), lambda j: (0, 0)),     # beta
                pl.BlockSpec((tnid, C_FEAT), lambda j: (j, 0)),  # W tile
            ],
            out_specs=pl.BlockSpec((n, tnid), lambda j: (0, j)),
        ),
        compiler_params=pltpu.CompilerParams(
            dimension_semantics=("parallel",),
            vmem_limit_bytes=48 * 1024 * 1024,
        ),
    )(gf, bn_gamma.reshape(1, C_FEAT), bn_beta.reshape(1, C_FEAT), w)

    return gf, logits_pad[:, :n_id]


# ---------------------------------------------------------------------------
# Kernel 3 (eval): BatchNorm1d (running stats) + row-wise L2 normalize.
# ---------------------------------------------------------------------------
def _bn_l2norm_kernel(gf_ref, gamma_ref, beta_ref, rmean_ref, rvar_ref, out_ref):
    gf = gf_ref[...]                                        # (TN, 2048) f32
    bn = (gf - rmean_ref[...]) * jax.lax.rsqrt(rvar_ref[...] + EPS_BN)
    bn = bn * gamma_ref[...] + beta_ref[...]
    sumsq = jnp.sum(bn * bn, axis=1, keepdims=True)
    # F.normalize: v / max(||v||, eps)  ==  v * rsqrt(max(||v||^2, eps^2))
    out_ref[...] = (
        bn * jax.lax.rsqrt(jnp.maximum(sumsq, EPS_NORM * EPS_NORM))
    ).astype(out_ref.dtype)


def bnneck_linear_eval(features, bn_gamma, bn_beta, running_mean, running_var):
    """Eval-mode forward. features: NCHW. Returns L2-normalized bn features."""
    gf = global_avg_pool(features)
    n = gf.shape[0]
    tn = _pick_tile(n, (64, 32, 16, 8))
    param = pl.BlockSpec((1, C_FEAT), lambda i: (0, 0))
    return pl.pallas_call(
        _bn_l2norm_kernel,
        out_shape=jax.ShapeDtypeStruct((n, C_FEAT), jnp.float32),
        grid_spec=pltpu.PrefetchScalarGridSpec(
            num_scalar_prefetch=0,
            grid=(n // tn,),
            in_specs=[pl.BlockSpec((tn, C_FEAT), lambda i: (i, 0)),
                      param, param, param, param],
            out_specs=pl.BlockSpec((tn, C_FEAT), lambda i: (i, 0)),
        ),
        compiler_params=pltpu.CompilerParams(
            dimension_semantics=("parallel",),
            vmem_limit_bytes=48 * 1024 * 1024,
        ),
    )(gf, bn_gamma.reshape(1, C_FEAT), bn_beta.reshape(1, C_FEAT),
      running_mean.reshape(1, C_FEAT), running_var.reshape(1, C_FEAT))


# ---------------------------------------------------------------------------
# Pure-JAX references for correctness checking
# ---------------------------------------------------------------------------
def _ref_train(features, gamma, beta, w):
    gf = jnp.mean(features.astype(jnp.float32), axis=(2, 3))
    mu = jnp.mean(gf, axis=0, keepdims=True)
    var = jnp.mean((gf - mu) ** 2, axis=0, keepdims=True)
    bn = (gf - mu) / jnp.sqrt(var + EPS_BN) * gamma + beta
    logits = jnp.dot(bn, w.T, precision=jax.lax.Precision.HIGHEST)
    return gf, logits


def _ref_eval(features, gamma, beta, rmean, rvar):
    gf = jnp.mean(features.astype(jnp.float32), axis=(2, 3))
    bn = (gf - rmean) / jnp.sqrt(rvar + EPS_BN) * gamma + beta
    norm = jnp.sqrt(jnp.sum(bn * bn, axis=1, keepdims=True))
    return bn / jnp.maximum(norm, EPS_NORM)


if __name__ == "__main__":
    key = jax.random.PRNGKey(0)
    k_x, k_w = jax.random.split(key)

    N, H, W = 2, 4, 4
    N_ID = 200  # not a multiple of 128 -> exercises the lane-padding path

    features = jax.random.normal(k_x, (N, C_FEAT, H, W), dtype=jnp.float32)

    # Parameter init matching the PyTorch __init__:
    #   BatchNorm1d after weights_init_kaiming: weight=1, bias=0 (bias frozen),
    #   fresh running stats: mean=0, var=1.
    bn_gamma = jnp.ones((C_FEAT,), jnp.float32)
    bn_beta = jnp.zeros((C_FEAT,), jnp.float32)
    running_mean = jnp.zeros((C_FEAT,), jnp.float32)
    running_var = jnp.ones((C_FEAT,), jnp.float32)
    #   classifier Linear: normal(std=0.001), no bias.
    cls_weight = 0.001 * jax.random.normal(k_w, (N_ID, C_FEAT), dtype=jnp.float32)

    gf_ref, logits_ref = _ref_train(features, bn_gamma, bn_beta, cls_weight)

    # Training-mode forward, f32 MXU operands: tight check.
    gf_f32, logits_f32 = bnneck_linear_train(
        features, bn_gamma, bn_beta, cls_weight, use_bf16_matmul=False)
    jax.block_until_ready((gf_f32, logits_f32))
    assert jnp.allclose(gf_f32, gf_ref, atol=1e-5, rtol=1e-5)
    assert jnp.allclose(logits_f32, logits_ref, atol=1e-4, rtol=1e-4)

    # Training-mode forward, default bf16-operand MXU path: looser check
    # (classifier weights have std=1e-3, so absolute logit error ~1e-4).
    gf, logits = bnneck_linear_train(features, bn_gamma, bn_beta, cls_weight)
    jax.block_until_ready((gf, logits))
    assert jnp.allclose(gf, gf_ref, atol=1e-5, rtol=1e-5)
    assert jnp.allclose(logits, logits_ref, atol=3e-3, rtol=3e-2)

    # Eval-mode forward.
    out_eval = bnneck_linear_eval(features, bn_gamma, bn_beta,
                                  running_mean, running_var)
    jax.block_until_ready(out_eval)
    out_ref = _ref_eval(features, bn_gamma, bn_beta, running_mean, running_var)
    assert jnp.allclose(out_eval, out_ref, atol=1e-5, rtol=1e-5)

    print("KERNEL_OK")
</pallas_src>

<mosaic_0001>
module attributes {stable_mosaic.version = 11 : i64} {
  func.func @_gap_kernel(%arg0: i32, %arg1: i32, %arg2: i32, %arg3: memref<2x256x16xf32, #tpu.memory_space<vmem>>, %arg4: memref<2x256xf32, #tpu.memory_space<vmem>>, %arg5: memref<2x256xf32, #tpu.memory_space<vmem>>) attributes {dimension_semantics = [#tpu.dimension_semantics<parallel>, #tpu.dimension_semantics<parallel>, #tpu.dimension_semantics<arbitrary>], iteration_bounds = array<i64: 1, 8, 1>, scalar_prefetch = 0 : i64, scratch_operands = 1 : i64, tpu.core_type = #tpu.core_type<tc>, window_params = [{transform_indices = @transform_0, window_bounds = array<i64: 2, 256, 16>}, {transform_indices = @transform_1, window_bounds = array<i64: 2, 256>}]} {
    %c0_i32 = arith.constant 0 : i32
    %0 = arith.cmpi eq, %arg2, %c0_i32 : i32
    %1 = arith.extui %0 : i1 to i32
    %c0_i32_0 = arith.constant 0 : i32
    %2 = arith.cmpi ne, %1, %c0_i32_0 : i32
    scf.if %2 {
      %cst_9 = arith.constant 0.000000e+00 : f32
      %11 = vector.broadcast %cst_9 : f32 to vector<2x256xf32>
      %c0_10 = arith.constant 0 : index
      %c0_11 = arith.constant 0 : index
      %12 = vector.load %arg5[%c0_10, %c0_11] : memref<2x256xf32, #tpu.memory_space<vmem>>, vector<2x256xf32>
      tpu.vector_store %arg5[%c0_10, %c0_11], %11 {strides = array<i32>} : memref<2x256xf32, #tpu.memory_space<vmem>>, vector<2x256xf32>,
    } else {
    }
    %c0 = arith.constant 0 : index
    %c0_1 = arith.constant 0 : index
    %3 = vector.load %arg5[%c0, %c0_1] : memref<2x256xf32, #tpu.memory_space<vmem>>, vector<2x256xf32>
    %c0_2 = arith.constant 0 : index
    %c0_3 = arith.constant 0 : index
    %c0_4 = arith.constant 0 : index
    %4 = vector.load %arg3[%c0_2, %c0_3, %c0_4] : memref<2x256x16xf32, #tpu.memory_space<vmem>>, vector<2x256x16xf32>
    %cst = arith.constant dense<0.000000e+00> : vector<2x256xf32>
    %5 = vector.multi_reduction <add>, %4, %cst [2] : vector<2x256x16xf32> to vector<2x256xf32>
    %6 = arith.addf %3, %5 : vector<2x256xf32>
    %c0_5 = arith.constant 0 : index
    %c0_6 = arith.constant 0 : index
    %7 = vector.load %arg5[%c0_5, %c0_6] : memref<2x256xf32, #tpu.memory_space<vmem>>, vector<2x256xf32>
    tpu.vector_store %arg5[%c0_5, %c0_6], %6 {strides = array<i32>} : memref<2x256xf32, #tpu.memory_space<vmem>>, vector<2x256xf32>,
    %c0_i32_7 = arith.constant 0 : i32
    %8 = arith.cmpi eq, %arg2, %c0_i32_7 : i32
    %9 = arith.extui %8 : i1 to i32
    %c0_i32_8 = arith.constant 0 : i32
    %10 = arith.cmpi ne, %9, %c0_i32_8 : i32
    scf.if %10 {
      %c0_9 = arith.constant 0 : index
      %c0_10 = arith.constant 0 : index
      %11 = vector.load %arg5[%c0_9, %c0_10] : memref<2x256xf32, #tpu.memory_space<vmem>>, vector<2x256xf32>
      %cst_11 = arith.constant 6.250000e-02 : f32
      %12 = vector.broadcast %cst_11 : f32 to vector<2x256xf32>
      %13 = arith.mulf %11, %12 : vector<2x256xf32>
      %c0_12 = arith.constant 0 : index
      %c0_13 = arith.constant 0 : index
      %14 = vector.load %arg4[%c0_12, %c0_13] : memref<2x256xf32, #tpu.memory_space<vmem>>, vector<2x256xf32>
      tpu.vector_store %arg4[%c0_12, %c0_13], %13 {strides = array<i32>} : memref<2x256xf32, #tpu.memory_space<vmem>>, vector<2x256xf32>,
    } else {
    }
    return
  }
  func.func @transform_0(%arg0: i32, %arg1: i32, %arg2: i32) -> (i32, i32, i32) {
    %c0_i32 = arith.constant 0 : i32
    return %arg0, %arg1, %arg2 : i32, i32, i32
  }
  func.func @transform_1(%arg0: i32, %arg1: i32, %arg2: i32) -> (i32, i32) {
    %c0_i32 = arith.constant 0 : i32
    return %arg0, %arg1 : i32, i32
  }
}

</mosaic_0001>

<bundles_post_ra>
// kernel: tpu_custom_call.1
= control target key start
LH: loop header
LB: loop body
LE: loop exit
PB: predicated region body
PF: predicated region fallthrough
CT: control target
= control target key end

     0   :  { %6 = vsyncpa [#allocation5], 0  ;;  %s5860_s0 = inlined_call_operand.vmem [shape: f32[2,2048,16], index: 0, kind: input, shape index: {}]   ;;  %s5861_s1 = inlined_call_operand.hbm [shape: f32[2,2048], index: 1, kind: output, shape index: {}]  }
   0x1   :  { %8 = vsyncpa [#allocation5 + $0x1], 0  ;;  %s4480_s6 = smov 0   ;;  %s4482_s7 = smov 0  }
   0x2   :  { %s4484_s8 = smov 0   ;;  %s4486_s9 = smov 0  }
   0x3   :  { %s4488_s10 = smov 0   ;;  %s4490_s11 = smov 0  }
   0x4 LB: > { %s4301_s12 = sadd.s32 4294967295, %s4460_s11   ;;  %s4302_s13 = sadd.s32 4294967294, %s4460_s11   ;;  %s4460_s11 = sphi %s4490_s11, %s14_s11   ;;  %s4456_s10 = sphi %s4488_s10, %s5868_s10   ;;  %s4452_s9 = sphi %s4486_s9, %s5867_s9   ;;  %s4448_s8 = sphi %s4484_s8, %s5866_s8   ;;  %s4444_s7 = sphi %s4482_s7, %s5865_s7   ;;  %s4440_s6 = sphi %s4480_s6, %s5864_s6  }
   0x5   : > { %s29_s14 = sadd.s32 1, %s4456_s10  ;;  %s44_s15 = sadd.s32 1, %s4448_s8 }
   0x6   : > { %p31_p0 = scmp.ge.s32.totalorder %s29_s14, 8  ;;  %p51_p1 = scmp.ne.s32.totalorder %s4448_s8, %s4444_s7 }
   0x7   : > { %p52_p2 = scmp.eq.s32.totalorder %s4460_s11, 0  ;;  %p83_p3 = scmp.eq.s32.totalorder %s4301_s12, 7 }
   0x8   : > { %s5870_s14 = smov (%p31_p0, %s29_s14), 0  ;;  %p88_p6 = scmp.ne.s32.totalorder %s4444_s7, %s4440_s6 }
   0x9   : > { %p53_p4 = por %p52_p2, %p51_p1  ;;  %p4519_p5 = por %p83_p3, %p51_p1 }
   0xa   : > { %s38_s17 = ssub.s32 %s4456_s10, %s5870_s14  ;;  %p89_p8 = scmp.eq.s32.totalorder %s4302_s13, 7 }
   0xb   : > { %p42_p7 = scmp.eq.s32.totalorder %s38_s17, 0  ;;  %p4304_p10 = scmp.ge.s32.totalorder %s4460_s11, 8 }
   0xc   : > { %p4530_p9 = por %p89_p8, %p88_p6 }
   0xd   : > { %s4528_s18 = scalar_select %p42_p7, %s4448_s8, %s44_s15  }
   0xe   : > { %105 = sbr.rel (%p4304_p10) target bundleno = 57 (0x39), region = 16 }
  0x15   : > { %108 = sbr.rel (!%p53_p4) target bundleno = 57 (0x39), region = 20  ;;  %s110_s20 = sand.u32 (%p53_p4), 1, %s4448_s8  }
  0x16   : > { %s4316_s21 = sshll.u32 (%p53_p4), %s4456_s10, 8  ;;  %s4305_s22 = sshll.u32 (%p53_p4), %s110_s20, 9 }
  0x17   : > { %s4540_s25 = scalar_lea.vmem (%p53_p4), %s5860_s0, %s4316_s21  ;;  %s4545_s26 = scalar_lea.vmem (%p53_p4), [#allocation3], %s4305_s22 }
  0x18   : > { %v273_v0 = vld [vmem:[%s4540_s25] sm:$0xff] (%p53_p4)  ;;  %v275_v1 = vld [vmem:[%s4540_s25 + $0x8] sm:$0xff] (%p53_p4)  ;;  %v277_v2 = vld [vmem:[%s4540_s25 + $0x10] sm:$0xff] (%p53_p4) }
  0x19   : > { %274 = vst [vmem:[%s4545_s26] sm:$0xff] (%p53_p4), %v273_v0  ;;  %276 = vst [vmem:[%s4545_s26 + $0x8] sm:$0xff] (%p53_p4), %v275_v1  ;;  %v279_v3 = vld [vmem:[%s4540_s25 + $0x18] sm:$0xff] (%p53_p4)  ;;  %v281_v4 = vld [vmem:[%s4540_s25 + $0x20] sm:$0xff] (%p53_p4) }
  0x1a   : > { %278 = vst [vmem:[%s4545_s26 + $0x10] sm:$0xff] (%p53_p4), %v277_v2  ;;  %v283_v5 = vld [vmem:[%s4540_s25 + $0x28] sm:$0xff] (%p53_p4)  ;;  %280 = vst [vmem:[%s4545_s26 + $0x18] sm:$0xff] (%p53_p4), %v279_v3  ;;  %v285_v6 = vld [vmem:[%s4540_s25 + $0x30] sm:$0xff] (%p53_p4) }
  0x1b   : > { %282 = vst [vmem:[%s4545_s26 + $0x20] sm:$0xff] (%p53_p4), %v281_v4  ;;  %284 = vst [vmem:[%s4545_s26 + $0x28] sm:$0xff] (%p53_p4), %v283_v5  ;;  %v287_v7 = vld [vmem:[%s4540_s25 + $0x38] sm:$0xff] (%p53_p4)  ;;  %v289_v8 = vld [vmem:[%s4540_s25 + $0x40] sm:$0xff] (%p53_p4) }
  0x1c   : > { %286 = vst [vmem:[%s4545_s26 + $0x30] sm:$0xff] %v285_v6  ;;  %288 = vst [vmem:[%s4545_s26 + $0x38] sm:$0xff] %v287_v7  ;;  %v291_v9 = vld [vmem:[%s4540_s25 + $0x48] sm:$0xff]  ;;  %v293_v10 = vld [vmem:[%s4540_s25 + $0x50] sm:$0xff] }
  0x1d   : > { %290 = vst [vmem:[%s4545_s26 + $0x40] sm:$0xff] %v289_v8  ;;  %v295_v11 = vld [vmem:[%s4540_s25 + $0x58] sm:$0xff]  ;;  %292 = vst [vmem:[%s4545_s26 + $0x48] sm:$0xff] %v291_v9  ;;  %v297_v12 = vld [vmem:[%s4540_s25 + $0x60] sm:$0xff] }
  0x1e   : > { %294 = vst [vmem:[%s4545_s26 + $0x50] sm:$0xff] %v293_v10  ;;  %296 = vst [vmem:[%s4545_s26 + $0x58] sm:$0xff] %v295_v11  ;;  %v299_v13 = vld [vmem:[%s4540_s25 + $0x68] sm:$0xff]  ;;  %v301_v14 = vld [vmem:[%s4540_s25 + $0x70] sm:$0xff] }
  0x1f   : > { %298 = vst [vmem:[%s4545_s26 + $0x60] sm:$0xff] %v297_v12  ;;  %300 = vst [vmem:[%s4545_s26 + $0x68] sm:$0xff] %v299_v13  ;;  %v303_v15 = vld [vmem:[%s4540_s25 + $0x78] sm:$0xff]  ;;  %v305_v16 = vld [vmem:[%s4540_s25 + $0x80] sm:$0xff] }
  0x20   : > { %302 = vst [vmem:[%s4545_s26 + $0x70] sm:$0xff] %v301_v14  ;;  %v307_v17 = vld [vmem:[%s4540_s25 + $0x88] sm:$0xff]  ;;  %304 = vst [vmem:[%s4545_s26 + $0x78] sm:$0xff] %v303_v15  ;;  %v309_v18 = vld [vmem:[%s4540_s25 + $0x90] sm:$0xff] }
  0x21   : > { %306 = vst [vmem:[%s4545_s26 + $0x80] sm:$0xff] %v305_v16  ;;  %308 = vst [vmem:[%s4545_s26 + $0x88] sm:$0xff] %v307_v17  ;;  %v311_v19 = vld [vmem:[%s4540_s25 + $0x98] sm:$0xff]  ;;  %v313_v20 = vld [vmem:[%s4540_s25 + $0xa0] sm:$0xff] }
  0x22   : > { %310 = vst [vmem:[%s4545_s26 + $0x90] sm:$0xff] %v309_v18  ;;  %312 = vst [vmem:[%s4545_s26 + $0x98] sm:$0xff] %v311_v19  ;;  %v315_v21 = vld [vmem:[%s4540_s25 + $0xa8] sm:$0xff]  ;;  %v317_v22 = vld [vmem:[%s4540_s25 + $0xb0] sm:$0xff] }
  0x23   : > { %314 = vst [vmem:[%s4545_s26 + $0xa0] sm:$0xff] %v313_v20  ;;  %v319_v23 = vld [vmem:[%s4540_s25 + $0xb8] sm:$0xff]  ;;  %316 = vst [vmem:[%s4545_s26 + $0xa8] sm:$0xff] %v315_v21  ;;  %v321_v24 = vld [vmem:[%s4540_s25 + $0xc0] sm:$0xff] }
  0x24   : > { %318 = vst [vmem:[%s4545_s26 + $0xb0] sm:$0xff] %v317_v22  ;;  %320 = vst [vmem:[%s4545_s26 + $0xb8] sm:$0xff] %v319_v23  ;;  %v323_v25 = vld [vmem:[%s4540_s25 + $0xc8] sm:$0xff]  ;;  %v325_v26 = vld [vmem:[%s4540_s25 + $0xd0] sm:$0xff] }
  0x25   : > { %322 = vst [vmem:[%s4545_s26 + $0xc0] sm:$0xff] %v321_v24  ;;  %324 = vst [vmem:[%s4545_s26 + $0xc8] sm:$0xff] %v323_v25  ;;  %v327_v27 = vld [vmem:[%s4540_s25 + $0xd8] sm:$0xff]  ;;  %v329_v28 = vld [vmem:[%s4540_s25 + $0xe0] sm:$0xff] }
  0x26   : > { %326 = vst [vmem:[%s4545_s26 + $0xd0] sm:$0xff] %v325_v26  ;;  %v331_v29 = vld [vmem:[%s4540_s25 + $0xe8] sm:$0xff]  ;;  %328 = vst [vmem:[%s4545_s26 + $0xd8] sm:$0xff] %v327_v27  ;;  %v333_v30 = vld [vmem:[%s4540_s25 + $0xf0] sm:$0xff] }
  0x27   : > { %330 = vst [vmem:[%s4545_s26 + $0xe0] sm:$0xff] %v329_v28  ;;  %332 = vst [vmem:[%s4545_s26 + $0xe8] sm:$0xff] %v331_v29  ;;  %v335_v31 = vld [vmem:[%s4540_s25 + $0xf8] sm:$0xff]  ;;  %v337_v32 = vld [vmem:[%s4540_s25 + $0x800] sm:$0xff] }
  0x28   : > { %334 = vst [vmem:[%s4545_s26 + $0xf0] sm:$0xff] %v333_v30  ;;  %336 = vst [vmem:[%s4545_s26 + $0xf8] sm:$0xff] %v335_v31  ;;  %v339_v33 = vld [vmem:[%s4540_s25 + $0x808] sm:$0xff]  ;;  %v341_v34 = vld [vmem:[%s4540_s25 + $0x810] sm:$0xff] }
  0x29   : > { %338 = vst [vmem:[%s4545_s26 + $0x100] sm:$0xff] %v337_v32  ;;  %v343_v35 = vld [vmem:[%s4540_s25 + $0x818] sm:$0xff]  ;;  %340 = vst [vmem:[%s4545_s26 + $0x108] sm:$0xff] %v339_v33  ;;  %v345_v36 = vld [vmem:[%s4540_s25 + $0x820] sm:$0xff] }
  0x2a   : > { %342 = vst [vmem:[%s4545_s26 + $0x110] sm:$0xff] %v341_v34  ;;  %344 = vst [vmem:[%s4545_s26 + $0x118] sm:$0xff] %v343_v35  ;;  %v347_v37 = vld [vmem:[%s4540_s25 + $0x828] sm:$0xff]  ;;  %v349_v38 = vld [vmem:[%s4540_s25 + $0x830] sm:$0xff] }
  0x2b   : > { %346 = vst [vmem:[%s4545_s26 + $0x120] sm:$0xff] %v345_v36  ;;  %348 = vst [vmem:[%s4545_s26 + $0x128] sm:$0xff] %v347_v37  ;;  %v351_v39 = vld [vmem:[%s4540_s25 + $0x838] sm:$0xff]  ;;  %v353_v40 = vld [vmem:[%s4540_s25 + $0x840] sm:$0xff] }
  0x2c   : > { %350 = vst [vmem:[%s4545_s26 + $0x130] sm:$0xff] %v349_v38  ;;  %v355_v41 = vld [vmem:[%s4540_s25 + $0x848] sm:$0xff]  ;;  %352 = vst [vmem:[%s4545_s26 + $0x138] sm:$0xff] %v351_v39  ;;  %v357_v42 = vld [vmem:[%s4540_s25 + $0x850] sm:$0xff] }
  0x2d   : > { %354 = vst [vmem:[%s4545_s26 + $0x140] sm:$0xff] %v353_v40  ;;  %356 = vst [vmem:[%s4545_s26 + $0x148] sm:$0xff] %v355_v41  ;;  %v359_v43 = vld [vmem:[%s4540_s25 + $0x858] sm:$0xff]  ;;  %v361_v44 = vld [vmem:[%s4540_s25 + $0x860] sm:$0xff] }
  0x2e   : > { %358 = vst [vmem:[%s4545_s26 + $0x150] sm:$0xff] %v357_v42  ;;  %360 = vst [vmem:[%s4545_s26 + $0x158] sm:$0xff] %v359_v43  ;;  %v363_v45 = vld [vmem:[%s4540_s25 + $0x868] sm:$0xff]  ;;  %v365_v46 = vld [vmem:[%s4540_s25 + $0x870] sm:$0xff] }
  0x2f   : > { %362 = vst [vmem:[%s4545_s26 + $0x160] sm:$0xff] %v361_v44  ;;  %v367_v47 = vld [vmem:[%s4540_s25 + $0x878] sm:$0xff]  ;;  %364 = vst [vmem:[%s4545_s26 + $0x168] sm:$0xff] %v363_v45  ;;  %v369_v48 = vld [vmem:[%s4540_s25 + $0x880] sm:$0xff] }
  0x30   : > { %366 = vst [vmem:[%s4545_s26 + $0x170] sm:$0xff] %v365_v46  ;;  %368 = vst [vmem:[%s4545_s26 + $0x178] sm:$0xff] %v367_v47  ;;  %v371_v49 = vld [vmem:[%s4540_s25 + $0x888] sm:$0xff]  ;;  %v373_v50 = vld [vmem:[%s4540_s25 + $0x890] sm:$0xff] }
  0x31   : > { %370 = vst [vmem:[%s4545_s26 + $0x180] sm:$0xff] %v369_v48  ;;  %372 = vst [vmem:[%s4545_s26 + $0x188] sm:$0xff] %v371_v49  ;;  %v375_v51 = vld [vmem:[%s4540_s25 + $0x898] sm:$0xff]  ;;  %v377_v52 = vld [vmem:[%s4540_s25 + $0x8a0] sm:$0xff] }
  0x32   : > { %374 = vst [vmem:[%s4545_s26 + $0x190] sm:$0xff] %v373_v50  ;;  %v379_v53 = vld [vmem:[%s4540_s25 + $0x8a8] sm:$0xff]  ;;  %376 = vst [vmem:[%s4545_s26 + $0x198] sm:$0xff] %v375_v51  ;;  %v381_v54 = vld [vmem:[%s4540_s25 + $0x8b0] sm:$0xff] }
  0x33   : > { %378 = vst [vmem:[%s4545_s26 + $0x1a0] sm:$0xff] %v377_v52  ;;  %380 = vst [vmem:[%s4545_s26 + $0x1a8] sm:$0xff] %v379_v53  ;;  %v383_v55 = vld [vmem:[%s4540_s25 + $0x8b8] sm:$0xff]  ;;  %v385_v56 = vld [vmem:[%s4540_s25 + $0x8c0] sm:$0xff] }
  0x34   : > { %382 = vst [vmem:[%s4545_s26 + $0x1b0] sm:$0xff] %v381_v54  ;;  %384 = vst [vmem:[%s4545_s26 + $0x1b8] sm:$0xff] %v383_v55  ;;  %v387_v57 = vld [vmem:[%s4540_s25 + $0x8c8] sm:$0xff]  ;;  %v389_v58 = vld [vmem:[%s4540_s25 + $0x8d0] sm:$0xff] }
  0x35   : > { %386 = vst [vmem:[%s4545_s26 + $0x1c0] sm:$0xff] %v385_v56  ;;  %v391_v59 = vld [vmem:[%s4540_s25 + $0x8d8] sm:$0xff]  ;;  %388 = vst [vmem:[%s4545_s26 + $0x1c8] sm:$0xff] %v387_v57  ;;  %v393_v60 = vld [vmem:[%s4540_s25 + $0x8e0] sm:$0xff] }
  0x36   : > { %390 = vst [vmem:[%s4545_s26 + $0x1d0] sm:$0xff] %v389_v58  ;;  %392 = vst [vmem:[%s4545_s26 + $0x1d8] sm:$0xff] %v391_v59  ;;  %v395_v61 = vld [vmem:[%s4540_s25 + $0x8e8] sm:$0xff]  ;;  %v397_v62 = vld [vmem:[%s4540_s25 + $0x8f0] sm:$0xff] }
  0x37   : > { %394 = vst [vmem:[%s4545_s26 + $0x1e0] sm:$0xff] %v393_v60  ;;  %396 = vst [vmem:[%s4545_s26 + $0x1e8] sm:$0xff] %v395_v61  ;;  %v399_v63 = vld [vmem:[%s4540_s25 + $0x8f8] sm:$0xff] }
  0x38   : > { %398 = vst [vmem:[%s4545_s26 + $0x1f0] sm:$0xff] %v397_v62  ;;  %400 = vst [vmem:[%s4545_s26 + $0x1f8] sm:$0xff] %v399_v63 }
  0x39 PF: > { %p4308_p11 = scmp.ge.s32.totalorder %s4460_s11, 1  ;;  %p405_p12 = scmp.lt.s32.totalorder %s4460_s11, 9 }
  0x3b   : > { %p406_p13 = pnand %p4308_p11, %p405_p12 }
  0x3c   : > { %s4675_s27 = sand.u32 (!%p406_p13), 1, %s4444_s7   ;;  %vm504_vm0 = vcmask (!%p406_p13), 130048   ;;  %vm3844_vm1 = vcmask (!%p406_p13), 130112   ;;  %vm3851_vm2 = vcmask (!%p406_p13), 195712   ;;  %vm3858_vm3 = vcmask (!%p406_p13), 261312   ;;  %s4317_s2 = sshll.u32 (!%p406_p13), %s4452_s9, 6 }
  0x3d   : > { %409 = sbr.rel (%p406_p13) target bundleno = 528 (0x210), region = 58  ;;  %s4309_s28 = sshll.u32 (!%p406_p13), %s4675_s27, 9  ;;  %vm3865_vm4 = vcmask (!%p406_p13), 326912   ;;  %vm3872_vm5 = vcmask (!%p406_p13), 392512   ;;  %vm3879_vm6 = vcmask (!%p406_p13), 458112   ;;  %vm3886_vm7 = vcmask (!%p406_p13), 523712  }
  0x3e   : > { %s4678_s29 = scalar_lea.vmem (!%p406_p13), [#allocation3], %s4309_s28  ;;  %vm3893_vm8 = vcmask (!%p406_p13), 589312   ;;  %vm3900_vm9 = vcmask (!%p406_p13), 654912   ;;  %vm3907_vm10 = vcmask (!%p406_p13), 720512   ;;  %vm3914_vm11 = vcmask (!%p406_p13), 786112   ;;  %s4310_s30 = sshll.u32 (!%p406_p13), %s4675_s27, 2 }
  0x3f   : > { %v442_v0 = vld [vmem:[%s4678_s29 + $0x10] sm:$0xff] (!%p406_p13)  ;;  %v440_v1 = vld [vmem:[%s4678_s29] sm:$0xff] (!%p406_p13)  ;;  %v443_v2 = vld [vmem:[%s4678_s29 + $0x18] sm:$0xff] (!%p406_p13)  ;;  %vm3921_vm12 = vcmask (!%p406_p13), 851712   ;;  %vm3928_vm13 = vcmask (!%p406_p13), 917312   ;;  %vm3935_vm14 = vcmask (!%p406_p13), 982912   ;;  %s5812_s13 = scalar_lea.hbm (!%p406_p13), %s5861_s1, %s4317_s2 }
  0x40   : > { %v511_v3 = vsel (!%p406_p13), %vm504_vm0, %v442_v0, 0.0  ;;  %v505_v4 = vsel (!%p406_p13), %vm504_vm0, %v440_v1, 0.0  ;;  %v441_v5 = vld [vmem:[%s4678_s29 + $0x8] sm:$0xff] (!%p406_p13)  ;;  %v514_v6 = vsel (!%p406_p13), %vm504_vm0, %v443_v2, 0.0  ;;  %v444_v9 = vld [vmem:[%s4678_s29 + $0x20] sm:$0xff] (!%p406_p13)  ;;  %v447_v10 = vld [vmem:[%s4678_s29 + $0x38] sm:$0xff] (!%p406_p13) }
  0x41   : > { %512 = vadd.xlane.f32.xlu1 (!%p406_p13), %v511_v3  ;;  %506 = vadd.xlane.f32.xlu0 (!%p406_p13), %v505_v4  ;;  %v508_v7 = vsel (!%p406_p13), %vm504_vm0, %v441_v5, 0.0  ;;  %v445_v8 = vld [vmem:[%s4678_s29 + $0x28] sm:$0xff] (!%p406_p13)  ;;  %v517_v12 = vsel (!%p406_p13), %vm504_vm0, %v444_v9, 0.0  ;;  %v446_v13 = vld [vmem:[%s4678_s29 + $0x30] sm:$0xff] (!%p406_p13)  ;;  %v448_v15 = vld [vmem:[%s4678_s29 + $0x40] sm:$0xff] (!%p406_p13)  ;;  %v526_v18 = vsel (!%p406_p13), %vm504_vm0, %v447_v10, 0.0 }
  0x42   : > { %v520_v11 = vsel (!%p406_p13), %vm504_vm0, %v445_v8, 0.0  ;;  %v449_v14 = vld [vmem:[%s4678_s29 + $0x48] sm:$0xff] (!%p406_p13)  ;;  %v451_v16 = vld [vmem:[%s4678_s29 + $0x58] sm:$0xff] (!%p406_p13)  ;;  %v450_v17 = vld [vmem:[%s4678_s29 + $0x50] sm:$0xff] (!%p406_p13)  ;;  %v523_v19 = vsel (!%p406_p13), %vm504_vm0, %v446_v13, 0.0  ;;  %v529_v21 = vsel (!%p406_p13), %vm504_vm0, %v448_v15, 0.0 }
  0x43   : > { %v532_v20 = vsel (!%p406_p13), %vm504_vm0, %v449_v14, 0.0  ;;  %v473_v22 = vld [vmem:[%s4678_s29 + $0x108] sm:$0xff] (!%p406_p13)  ;;  %v4704_v23 = vsel (!%p406_p13), %vm504_vm0, %v451_v16, 0.0  ;;  %v4707_v24 = vsel (!%p406_p13), %vm504_vm0, %v450_v17, 0.0  ;;  %v472_v26 = vld [vmem:[%s4678_s29 + $0x100] sm:$0xff] (!%p406_p13)  ;;  %v475_v27 = vld [vmem:[%s4678_s29 + $0x118] sm:$0xff] (!%p406_p13) }
  0x44   : > { %v4710_v25 = vsel %vm504_vm0, %v473_v22, 0.0  ;;  %v474_v28 = vld [vmem:[%s4678_s29 + $0x110] sm:$0xff]  ;;  %v4716_v29 = vsel %vm504_vm0, %v472_v26, 0.0  ;;  %v4719_v30 = vsel %vm504_vm0, %v475_v27, 0.0  ;;  %v477_v32 = vld [vmem:[%s4678_s29 + $0x128] sm:$0xff]  ;;  %v476_v33 = vld [vmem:[%s4678_s29 + $0x120] sm:$0xff] }
  0x45   : > { %515 = vadd.xlane.f32.xlu1 %v514_v6  ;;  %509 = vadd.xlane.f32.xlu0 %v508_v7  ;;  %v4722_v31 = vsel %vm504_vm0, %v474_v28, 0.0  ;;  %v479_v34 = vld [vmem:[%s4678_s29 + $0x138] sm:$0xff]  ;;  %v4728_v35 = vsel %vm504_vm0, %v477_v32, 0.0  ;;  %v4731_v36 = vsel %vm504_vm0, %v476_v33, 0.0  ;;  %v478_v38 = vld [vmem:[%s4678_s29 + $0x130] sm:$0xff]  ;;  %v481_v39 = vld [vmem:[%s4678_s29 + $0x148] sm:$0xff] }
  0x46   : > { %v4734_v37 = vsel %vm504_vm0, %v479_v34, 0.0  ;;  %v480_v40 = vld [vmem:[%s4678_s29 + $0x140] sm:$0xff]  ;;  %v4740_v41 = vsel %vm504_vm0, %v478_v38, 0.0  ;;  %v4743_v42 = vsel %vm504_vm0, %v481_v39, 0.0  ;;  %v483_v44 = vld [vmem:[%s4678_s29 + $0x158] sm:$0xff]  ;;  %v482_v45 = vld [vmem:[%s4678_s29 + $0x150] sm:$0xff] }
  0x47   : > { %v4746_v43 = vsel %vm504_vm0, %v480_v40, 0.0  ;;  %v485_v46 = vld [vmem:[%s4678_s29 + $0x168] sm:$0xff]  ;;  %v4752_v47 = vsel %vm504_vm0, %v483_v44, 0.0  ;;  %v4755_v48 = vsel %vm504_vm0, %v482_v45, 0.0  ;;  %v484_v50 = vld [vmem:[%s4678_s29 + $0x160] sm:$0xff]  ;;  %v487_v51 = vld [vmem:[%s4678_s29 + $0x178] sm:$0xff] }
  0x48   : > { %v4758_v49 = vsel %vm504_vm0, %v485_v46, 0.0  ;;  %v486_v52 = vld [vmem:[%s4678_s29 + $0x170] sm:$0xff]  ;;  %v4764_v53 = vsel %vm504_vm0, %v484_v50, 0.0  ;;  %v4767_v54 = vsel %vm504_vm0, %v487_v51, 0.0  ;;  %v489_v56 = vld [vmem:[%s4678_s29 + $0x188] sm:$0xff]  ;;  %v488_v57 = vld [vmem:[%s4678_s29 + $0x180] sm:$0xff] }
  0x49   : > { %521 = vadd.xlane.f32.xlu1 %v520_v11  ;;  %518 = vadd.xlane.f32.xlu0 %v517_v12  ;;  %v4770_v55 = vsel %vm504_vm0, %v486_v52, 0.0  ;;  %v491_v58 = vld [vmem:[%s4678_s29 + $0x198] sm:$0xff]  ;;  %v4776_v59 = vsel %vm504_vm0, %v489_v56, 0.0  ;;  %v4779_v60 = vsel %vm504_vm0, %v488_v57, 0.0  ;;  %v490_v62 = vld [vmem:[%s4678_s29 + $0x190] sm:$0xff]  ;;  %v493_v63 = vld [vmem:[%s4678_s29 + $0x1a8] sm:$0xff] }
  0x4a   : > { %v4782_v61 = vsel %vm504_vm0, %v491_v58, 0.0  ;;  %v492_v0 = vld [vmem:[%s4678_s29 + $0x1a0] sm:$0xff]  ;;  %v453_v1 = vld [vmem:[%s4678_s29 + $0x68] sm:$0xff]  ;;  %v4790_v3 = vsel %vm504_vm0, %v490_v62, 0.0  ;;  %v4793_v4 = vsel %vm504_vm0, %v493_v63, 0.0  ;;  %v494_v6 = vld [vmem:[%s4678_s29 + $0x1b0] sm:$0xff] }
  0x4b   : > { %v452_v2 = vld [vmem:[%s4678_s29 + $0x60] sm:$0xff]  ;;  %v4796_v5 = vsel %vm504_vm0, %v492_v0, 0.0  ;;  %v495_v7 = vld [vmem:[%s4678_s29 + $0x1b8] sm:$0xff]  ;;  %v4802_v9 = vsel %vm504_vm0, %v494_v6, 0.0  ;;  %v497_v12 = vld [vmem:[%s4678_s29 + $0x1c8] sm:$0xff]  ;;  %v544_v32 = vsel %vm504_vm0, %v453_v1, 0.0 }
  0x4c   : > { %v496_v8 = vld [vmem:[%s4678_s29 + $0x1c0] sm:$0xff]  ;;  %v4805_v10 = vsel %vm504_vm0, %v495_v7, 0.0  ;;  %v498_v13 = vld [vmem:[%s4678_s29 + $0x1d0] sm:$0xff]  ;;  %v4814_v15 = vsel %vm504_vm0, %v497_v12, 0.0  ;;  %v503_v27 = vld [vmem:[%s4678_s29 + $0x1f8] sm:$0xff]  ;;  %v541_v33 = vsel %vm504_vm0, %v452_v2, 0.0 }
  0x4d   : > { %527 = vadd.xlane.f32.xlu1 %v526_v18  ;;  %524 = vadd.xlane.f32.xlu0 %v523_v19  ;;  %v4808_v11 = vsel %vm504_vm0, %v496_v8, 0.0  ;;  %v500_v14 = vld [vmem:[%s4678_s29 + $0x1e0] sm:$0xff]  ;;  %v4817_v16 = vsel %vm504_vm0, %v498_v13, 0.0  ;;  %v499_v18 = vld [vmem:[%s4678_s29 + $0x1d8] sm:$0xff]  ;;  %v502_v19 = vld [vmem:[%s4678_s29 + $0x1f0] sm:$0xff]  ;;  %v4838_v28 = vsel %vm504_vm0, %v503_v27, 0.0 }
  0x4e   : > { %v4820_v17 = vsel %vm504_vm0, %v500_v14, 0.0  ;;  %v4829_v22 = vsel %vm504_vm0, %v502_v19, 0.0  ;;  %v4462_v34 = vmov 0   ;;  %v455_v38 = vld [vmem:[%s4678_s29 + $0x78] sm:$0xff]  ;;  %v454_v39 = vld [vmem:[%s4678_s29 + $0x70] sm:$0xff]  ;;  %v457_v40 = vld [vmem:[%s4678_s29 + $0x88] sm:$0xff] }
  0x4f   : > { %4380 = vset.pattern.permute.xlu0 %v4462_v34  ;;  %4381 = vset.pattern.permute.xlu1 %v4462_v34  ;;  %v456_v44 = vld [vmem:[%s4678_s29 + $0x80] sm:$0xff]  ;;  %v556_v45 = vsel %vm504_vm0, %v457_v40, 0.0  ;;  %v459_v50 = vld [vmem:[%s4678_s29 + $0x98] sm:$0xff]  ;;  %v458_v51 = vld [vmem:[%s4678_s29 + $0x90] sm:$0xff]  ;;  %vm3942_vm15 = vcmask 1048512   ;;  %s430_s3 = scalar_lea.vmem [#allocation4], %s4310_s30 }
  0x50   : > { %v553_v46 = vsel %vm504_vm0, %v456_v44, 0.0  ;;  %v562_v52 = vsel %vm504_vm0, %v459_v50, 0.0  ;;  %v559_v56 = vsel %vm504_vm0, %v458_v51, 0.0  ;;  %v461_v57 = vld [vmem:[%s4678_s29 + $0xa8] sm:$0xff]  ;;  %v460_v58 = vld [vmem:[%s4678_s29 + $0xa0] sm:$0xff]  ;;  %v463_v0 = vld [vmem:[%s4678_s29 + $0xb8] sm:$0xff] }
  0x51   : > { %533 = vadd.xlane.f32.xlu1 %v532_v20  ;;  %530 = vadd.xlane.f32.xlu0 %v529_v21  ;;  %v501_v20 = vld [vmem:[%s4678_s29 + $0x1e8] sm:$0xff]  ;;  %v4826_v21 = vsel %vm504_vm0, %v499_v18, 0.0  ;;  %v568_v62 = vsel %vm504_vm0, %v461_v57, 0.0  ;;  %v565_v63 = vsel %vm504_vm0, %v460_v58, 0.0  ;;  %v462_v1 = vld [vmem:[%s4678_s29 + $0xb0] sm:$0xff]  ;;  %v574_v2 = vsel %vm504_vm0, %v463_v0, 0.0 }
  0x52   : > { %v4832_v26 = vsel %vm504_vm0, %v501_v20, 0.0  ;;  %v571_v6 = vsel %vm504_vm0, %v462_v1, 0.0  ;;  %v465_v7 = vld [vmem:[%s4678_s29 + $0xc8] sm:$0xff]  ;;  %v464_v8 = vld [vmem:[%s4678_s29 + $0xc0] sm:$0xff]  ;;  %v467_v14 = vld [vmem:[%s4678_s29 + $0xd8] sm:$0xff]  ;;  %s4218_s4 = sshll.u32 %s430_s3, 4  ;;  %s5814_s4 = int_to_ptr.vmem [resolvable:$true] %s4218_s4 }
  0x53   : > { %v580_v12 = vsel %vm504_vm0, %v465_v7, 0.0  ;;  %v577_v13 = vsel %vm504_vm0, %v464_v8, 0.0  ;;  %v466_v18 = vld [vmem:[%s4678_s29 + $0xd0] sm:$0xff]  ;;  %v586_v19 = vsel %vm504_vm0, %v467_v14, 0.0  ;;  %v469_v27 = vld [vmem:[%s4678_s29 + $0xe8] sm:$0xff]  ;;  %s4202_s15 = scalar_lea.sflag [#allocation5], %s4675_s27 }
  0x54   : > { %v583_v20 = vsel %vm504_vm0, %v466_v18, 0.0  ;;  %s4382_s17 = scalar_lea.vmem %s5814_s4, 64  ;;  %s4469_s9 = smov [#allocation4]  }
  0x55   : > { %539 = vadd.xlane.f32.xlu1 %v4704_v23  ;;  %536 = vadd.xlane.f32.xlu0 %v4707_v24  ;;  %v550_v23 = vsel %vm504_vm0, %v455_v38, 0.0  ;;  %v547_v24 = vsel %vm504_vm0, %v454_v39, 0.0  ;;  %v471_v38 = vld [vmem:[%s4678_s29 + $0xf8] sm:$0xff]  ;;  %v470_v39 = vld [vmem:[%s4678_s29 + $0xf0] sm:$0xff]  ;;  %p4383_p0 = scmp.ne.s32.totalorder %s5814_s4, %s4382_s17  ;;  %s4386_s20 = sshll.u32 %s4469_s9, 4  ;;  %s4387_s20 = int_to_ptr.vmem [resolvable:$false] %s4386_s20 }
  0x56   : > { %s4388_s21 = scalar_lea.vmem %s4387_s20, 128  ;;  %p4389_p3 = scmp.lt.s32.totalorder %s5814_s4, %s4387_s20 }
  0x57   : > { %p4384_p1 = pnand %p4383_p0, %p4519_p5  ;;  %p4390_p4 = scmp.lt.s32.totalorder %s4388_s21, %s4382_s17 }
  0x59   : > { %545 = vadd.xlane.f32.xlu1 %v544_v32  ;;  %542 = vadd.xlane.f32.xlu0 %v541_v33  ;;  %v468_v32 = vld [vmem:[%s4678_s29 + $0xe0] sm:$0xff]  ;;  %v592_v33 = vsel %vm504_vm0, %v469_v27, 0.0  ;;  %p4385_p2 = pneg %p4384_p1  ;;  %p4391_p6 = por %p4390_p4, %p4389_p3 }
  0x5a   : > { %v589_v34 = vsel %vm504_vm0, %v468_v32, 0.0 }
  0x5b   : > { %p4392_p7 = pnand %p4391_p6, %p4385_p2 }
  0x5d   : > { %551 = vadd.xlane.f32.xlu1 %v550_v23  ;;  %548 = vadd.xlane.f32.xlu0 %v547_v24  ;;  %v598_v23 = vsel %vm504_vm0, %v471_v38, 0.0  ;;  %v595_v24 = vsel %vm504_vm0, %v470_v39, 0.0  ;;  %vm4181_vm0 = vcmask 1041409  }
  0x61   : > { %557 = vadd.xlane.f32.xlu1 %v556_v45  ;;  %554 = vadd.xlane.f32.xlu0 %v553_v46 }
  0x65   : > { %563 = vadd.xlane.f32.xlu1 %v562_v52  ;;  %560 = vadd.xlane.f32.xlu0 %v559_v56 }
  0x69   : > { %569 = vadd.xlane.f32.xlu1 %v568_v62  ;;  %566 = vadd.xlane.f32.xlu0 %v565_v63 }
  0x6d   : > { %575 = vadd.xlane.f32.xlu1 %v574_v2  ;;  %572 = vadd.xlane.f32.xlu0 %v571_v6 }
  0x71   : > { %581 = vadd.xlane.f32.xlu1 %v580_v12  ;;  %578 = vadd.xlane.f32.xlu0 %v577_v13 }
  0x75   : > { %587 = vadd.xlane.f32.xlu1 %v586_v19  ;;  %584 = vadd.xlane.f32.xlu0 %v583_v20 }
  0x79   : > { %593 = vadd.xlane.f32.xlu1 %v592_v33  ;;  %590 = vadd.xlane.f32.xlu0 %v589_v34 }
  0x7d   : > { %599 = vadd.xlane.f32.xlu1 %v598_v23  ;;  %596 = vadd.xlane.f32.xlu0 %v595_v24 }
  0x81   : > { %605 = vadd.xlane.f32.xlu1 %v4710_v25  ;;  %602 = vadd.xlane.f32.xlu0 %v4716_v29  ;;  %v764_v25 = vlaneseq  ;;  %v4463_v29 = vmov 269488144  }
  0x85   : > { %611 = vadd.xlane.f32.xlu1 %v4719_v30  ;;  %608 = vadd.xlane.f32.xlu0 %v4722_v31  ;;  %v762_v30 = vunpack.c.l.s4 %v4463_v29  ;;  %v4464_v31 = vmov 842150450  }
  0x89   : > { %617 = vadd.xlane.f32.xlu1 %v4728_v35  ;;  %614 = vadd.xlane.f32.xlu0 %v4731_v36  ;;  %v769_v35 = vunpack.c.l.s4 %v4464_v31  ;;  %v4465_v36 = vmov 1414812756  }
  0x8d   : > { %623 = vadd.xlane.f32.xlu1 %v4734_v37  ;;  %620 = vadd.xlane.f32.xlu0 %v4740_v41  ;;  %v776_v37 = vunpack.c.l.s4 %v4465_v36  ;;  %v4466_v41 = vmov 1987475062  }
  0x91   : > { %629 = vadd.xlane.f32.xlu1 %v4743_v42  ;;  %626 = vadd.xlane.f32.xlu0 %v4746_v43  ;;  %v783_v42 = vunpack.c.l.s4 %v4466_v41  ;;  %v4911_v43 = vshrl.u32 %v764_v25, 7 }
  0x95   : > { %635 = vadd.xlane.f32.xlu1 %v4752_v47  ;;  %632 = vadd.xlane.f32.xlu0 %v4755_v48  ;;  %v763_v47 = vunpack.c.0.s8 %v762_v30  ;;  %v770_v48 = vunpack.c.0.s8 %v769_v35 }
  0x99   : > { %641 = vadd.xlane.f32.xlu1 %v4758_v49  ;;  %638 = vadd.xlane.f32.xlu0 %v4764_v53  ;;  %v777_v49 = vunpack.c.0.s8 %v776_v37  ;;  %v784_v53 = vunpack.c.0.s8 %v783_v42 }
  0x9d   : > { %647 = vadd.xlane.f32.xlu1 %v4767_v54  ;;  %644 = vadd.xlane.f32.xlu0 %v4770_v55  ;;  %v4467_v54 = vmov 1983009808  }
  0x9e   : > { %v2556_v55 = vunpack.c.l.s4 %v4467_v54 }
  0xa1   : > { %653 = vadd.xlane.f32.xlu1 %v4776_v59  ;;  %650 = vadd.xlane.f32.xlu0 %v4779_v60  ;;  %v4914_v59 = vsub.s32 %v763_v47, %v4911_v43  ;;  %v4917_v60 = vsub.s32 %v770_v48, %v4911_v43 }
  0xa5   : > { %659 = vadd.xlane.f32.xlu1 %v4782_v61  ;;  %656 = vadd.xlane.f32.xlu0 %v4790_v3  ;;  %v4920_v61 = vsub.s32 %v777_v49, %v4911_v43  ;;  %v4923_v3 = vsub.s32 %v784_v53, %v4911_v43 }
  0xa9   : > { %665 = vadd.xlane.f32.xlu1 %v4793_v4  ;;  %662 = vadd.xlane.f32.xlu0 %v4796_v5  ;;  %v2557_v4 = vunpack.c.0.s8 %v2556_v55 }
  0xad   : > { %668 = vadd.xlane.f32.xlu0 %v4802_v9  ;;  %671 = vadd.xlane.f32.xlu1 %v4805_v10 }
  0xb1   : > { %674 = vadd.xlane.f32.xlu0 %v4808_v11  ;;  %677 = vadd.xlane.f32.xlu1 %v4814_v15 }
  0xb5   : > { %680 = vadd.xlane.f32.xlu0 %v4817_v16  ;;  %683 = vadd.xlane.f32.xlu1 %v4826_v21 }
  0xb9   : > { %686 = vadd.xlane.f32.xlu0 %v4820_v17  ;;  %689 = vadd.xlane.f32.xlu1 %v4832_v26 }
  0xbd   : > { %692 = vadd.xlane.f32.xlu0 %v4829_v22  ;;  %695 = vadd.xlane.f32.xlu1 %v4838_v28  ;;  %v4934_v28 = vsub.s32 %v2557_v4, %v4911_v43 }
  0xce   : > { %v513_v5 = vpop.xlane.xlu1 %512  ;;  %v507_v9 = vpop.xlane.xlu0 %506 }
  0xcf   : > { %v823_v10 = vrot.slane %v513_v5, %v4914_v59  ;;  %v830_v11 = vrot.slane %v513_v5, %v4917_v60  ;;  %v837_v15 = vrot.slane %v513_v5, %v4920_v61  ;;  %v844_v16 = vrot.slane %v513_v5, %v4923_v3 }
  0xd0   : > { %v767_v17 = vrot.slane %v507_v9, %v4914_v59  ;;  %v774_v21 = vrot.slane %v507_v9, %v4917_v60  ;;  %v781_v22 = vrot.slane %v507_v9, %v4920_v61  ;;  %v788_v26 = vrot.slane %v507_v9, %v4923_v3 }
  0xd1   : > { %v2587_v50 = vcombine.low %v823_v10, %v830_v11  ;;  %v2588_v51 = vcombine.low %v837_v15, %v844_v16 }
  0xd2   : > { %v516_v40 = vpop.xlane.xlu1 %515  ;;  %v510_v44 = vpop.xlane.xlu0 %509  ;;  %v2553_v45 = vcombine.low %v767_v17, %v774_v21  ;;  %v2554_v46 = vcombine.low %v781_v22, %v788_v26 }
  0xd3   : > { %v795_v52 = vrot.slane %v510_v44, %v4914_v59  ;;  %v802_v56 = vrot.slane %v510_v44, %v4917_v60  ;;  %v809_v57 = vrot.slane %v510_v44, %v4920_v61  ;;  %v816_v58 = vrot.slane %v510_v44, %v4923_v3 }
  0xd4   : > { %v851_v62 = vrot.slane %v516_v40, %v4914_v59  ;;  %v858_v63 = vrot.slane %v516_v40, %v4917_v60  ;;  %v2561_v0 = vrot.slane %v2553_v45, %v4934_v28  ;;  %v2568_v1 = vrot.slane %v2554_v46, %v4934_v28 }
  0xd5   : > { %v865_v2 = vrot.slane %v516_v40, %v4920_v61  ;;  %v872_v6 = vrot.slane %v516_v40, %v4923_v3  ;;  %v2570_v12 = vcombine.low %v795_v52, %v802_v56  ;;  %v2571_v13 = vcombine.low %v809_v57, %v816_v58 }
  0xd6   : > { %v522_v7 = vpop.xlane.xlu1 %521  ;;  %v519_v8 = vpop.xlane.xlu0 %518  ;;  %v2595_v14 = vrot.slane %v2587_v50, %v4934_v28  ;;  %v2569_v18 = vcombine.low %v2561_v0, %v2568_v1  ;;  %v2602_v27 = vrot.slane %v2588_v51, %v4934_v28  ;;  %v2604_v39 = vcombine.low %v851_v62, %v858_v63 }
  0xd7   : > { %v2578_v19 = vrot.slane %v2570_v12, %v4934_v28  ;;  %v2585_v20 = vrot.slane %v2571_v13, %v4934_v28  ;;  %v879_v32 = vrot.slane %v519_v8, %v4914_v59  ;;  %v886_v33 = vrot.slane %v519_v8, %v4917_v60 }
  0xd8   : > { %v2605_v23 = vcombine.low %v865_v2, %v872_v6  ;;  %3642 = vperm.xlu0 %4380, %v2569_v18   ;;  %v907_v24 = vrot.slane %v522_v7, %v4914_v59  ;;  %v893_v29 = vrot.slane %v519_v8, %v4920_v61  ;;  %v900_v30 = vrot.slane %v519_v8, %v4923_v3 }
  0xd9   : > { %v914_v31 = vrot.slane %v522_v7, %v4917_v60  ;;  %v921_v35 = vrot.slane %v522_v7, %v4920_v61  ;;  %v928_v36 = vrot.slane %v522_v7, %v4923_v3  ;;  %v2586_v37 = vcombine.low %v2578_v19, %v2585_v20 }
  0xda   : > { %v4952_v34 = vpop.xlane.xlu1 %527  ;;  %v525_v38 = vpop.xlane.xlu0 %524  ;;  %v2603_v47 = vcombine.low %v2595_v14, %v2602_v27  ;;  %v2612_v48 = vrot.slane %v2604_v39, %v4934_v28  ;;  %v2619_v49 = vrot.slane %v2605_v23, %v4934_v28  ;;  %v2621_v53 = vcombine.low %v879_v32, %v886_v33 }
  0xdb   : > { %3645 = vperm.xlu1 %4381, %v2586_v37   ;;  %v963_v9 = vrot.slane %v4952_v34, %v4914_v59  ;;  %v970_v10 = vrot.slane %v4952_v34, %v4917_v60  ;;  %v977_v11 = vrot.slane %v4952_v34, %v4920_v61  ;;  %v2622_v15 = vcombine.low %v893_v29, %v900_v30 }
  0xdc   : > { %v984_v16 = vrot.slane %v4952_v34, %v4923_v3  ;;  %v935_v17 = vrot.slane %v525_v38, %v4914_v59  ;;  %v942_v26 = vrot.slane %v525_v38, %v4917_v60  ;;  %v949_v40 = vrot.slane %v525_v38, %v4920_v61 }
  0xdd   : > { %v956_v44 = vrot.slane %v525_v38, %v4923_v3  ;;  %v2620_v50 = vcombine.low %v2612_v48, %v2619_v49  ;;  %v2629_v58 = vrot.slane %v2621_v53, %v4934_v28  ;;  %v2636_v62 = vrot.slane %v2622_v15, %v4934_v28 }
  0xde   : > { %v534_v41 = vpop.xlane.xlu1 %533  ;;  %v4960_v42 = vpop.xlane.xlu0 %530  ;;  %v2638_v63 = vcombine.low %v907_v24, %v914_v31  ;;  %v2639_v0 = vcombine.low %v921_v35, %v928_v36  ;;  %v2655_v18 = vcombine.low %v935_v17, %v942_v26 }
  0xdf   : > { %v1019_v54 = vrot.slane %v534_v41, %v4914_v59  ;;  %v1026_v55 = vrot.slane %v534_v41, %v4917_v60  ;;  %v1033_v4 = vrot.slane %v534_v41, %v4920_v61  ;;  %v1040_v5 = vrot.slane %v534_v41, %v4923_v3  ;;  %3648 = vperm.xlu1 %4381, %v2603_v47  }
  0xe0   : > { %v991_v8 = vrot.slane %v4960_v42, %v4914_v59  ;;  %v998_v12 = vrot.slane %v4960_v42, %v4917_v60  ;;  %v2656_v19 = vcombine.low %v949_v40, %v956_v44  ;;  %v1005_v34 = vrot.slane %v4960_v42, %v4920_v61 }
  0xe1   : > { %v2706_v21 = vcombine.low %v1019_v54, %v1026_v55  ;;  %v2707_v22 = vcombine.low %v1033_v4, %v1040_v5  ;;  %v2637_v38 = vcombine.low %v2629_v58, %v2636_v62  ;;  %v2646_v39 = vrot.slane %v2638_v63, %v4934_v28 }
  0xe2   : > { %v540_v45 = vpop.xlane.xlu1 %539  ;;  %v4980_v46 = vpop.xlane.xlu0 %536  ;;  %v2653_v23 = vrot.slane %v2639_v0, %v4934_v28  ;;  %v1012_v35 = vrot.slane %v4960_v42, %v4923_v3  ;;  %v2663_v47 = vrot.slane %v2655_v18, %v4934_v28  ;;  %v2670_v48 = vrot.slane %v2656_v19, %v4934_v28 }
  0xe3   : > { %v1075_v51 = vrot.slane %v540_v45, %v4914_v59  ;;  %v1082_v52 = vrot.slane %v540_v45, %v4917_v60  ;;  %v1089_v56 = vrot.slane %v540_v45, %v4920_v61  ;;  %v1096_v57 = vrot.slane %v540_v45, %v4923_v3  ;;  %3651 = vperm.xlu1 %4381, %v2620_v50  }
  0xe4   : > { %v2714_v1 = vrot.slane %v2706_v21, %v4934_v28  ;;  %v2721_v2 = vrot.slane %v2707_v22, %v4934_v28  ;;  %v1047_v55 = vrot.slane %v4980_v46, %v4914_v59  ;;  %v2672_v4 = vcombine.low %v963_v9, %v970_v10 }
  0xe5   : > { %v2740_v6 = vcombine.low %v1075_v51, %v1082_v52  ;;  %v2741_v7 = vcombine.low %v1089_v56, %v1096_v57  ;;  %v2673_v5 = vcombine.low %v977_v11, %v984_v16  ;;  %v2654_v17 = vcombine.low %v2646_v39, %v2653_v23 }
  0xe6   : > { %v546_v13 = vpop.xlane.xlu1 %545  ;;  %v4994_v14 = vpop.xlane.xlu0 %542  ;;  %v2722_v24 = vcombine.low %v2714_v1, %v2721_v2  ;;  %v1054_v26 = vrot.slane %v4980_v46, %v4917_v60  ;;  %v2671_v45 = vcombine.low %v2663_v47, %v2670_v48  ;;  %v2680_v52 = vrot.slane %v2672_v4, %v4934_v28 }
  0xe7   : > { %v1131_v20 = vrot.slane %v546_v13, %v4914_v59  ;;  %v1138_v27 = vrot.slane %v546_v13, %v4917_v60  ;;  %v1145_v32 = vrot.slane %v546_v13, %v4920_v61  ;;  %v1152_v33 = vrot.slane %v546_v13, %v4923_v3  ;;  %3654 = vperm.xlu1 %4381, %v2637_v38  }
  0xe8   : > { %v2748_v29 = vrot.slane %v2740_v6, %v4934_v28  ;;  %v2755_v30 = vrot.slane %v2741_v7, %v4934_v28  ;;  %3669 = vperm.xlu0 %4380, %v2722_v24   ;;  %v2687_v56 = vrot.slane %v2673_v5, %v4934_v28  ;;  %v2689_v57 = vcombine.low %v991_v8, %v998_v12 }
  0xe9   : > { %v2774_v31 = vcombine.low %v1131_v20, %v1138_v27  ;;  %v2775_v41 = vcombine.low %v1145_v32, %v1152_v33  ;;  %v2690_v0 = vcombine.low %v1005_v34, %v1012_v35  ;;  %v1061_v1 = vrot.slane %v4980_v46, %v4920_v61 }
  0xea   : > { %v552_v36 = vpop.xlane.xlu1 %551  ;;  %v5008_v37 = vpop.xlane.xlu0 %548  ;;  %v2756_v15 = vcombine.low %v2748_v29, %v2755_v30  ;;  %v1068_v2 = vrot.slane %v4980_v46, %v4923_v3  ;;  %v1103_v20 = vrot.slane %v4994_v14, %v4914_v59  ;;  %v2688_v32 = vcombine.low %v2680_v52, %v2687_v56 }
  0xeb   : > { %v1187_v49 = vrot.slane %v552_v36, %v4914_v59  ;;  %v1194_v53 = vrot.slane %v552_v36, %v4917_v60  ;;  %v1201_v54 = vrot.slane %v552_v36, %v4920_v61  ;;  %v1208_v42 = vrot.slane %v552_v36, %v4923_v3  ;;  %3657 = vperm.xlu1 %4381, %v2654_v17  }
  0xec   : > { %v2782_v21 = vrot.slane %v2774_v31, %v4934_v28  ;;  %v2789_v22 = vrot.slane %v2775_v41, %v4934_v28  ;;  %3675 = vperm.xlu0 %4380, %v2756_v15   ;;  %v2697_v46 = vrot.slane %v2689_v57, %v4934_v28  ;;  %v2704_v39 = vrot.slane %v2690_v0, %v4934_v28 }
  0xed   : > { %v2808_v50 = vcombine.low %v1187_v49, %v1194_v53  ;;  %v2809_v51 = vcombine.low %v1201_v54, %v1208_v42  ;;  %v2723_v31 = vcombine.low %v1047_v55, %v1054_v26  ;;  %v2724_v35 = vcombine.low %v1061_v1, %v1068_v2 }
  0xee   : > { %v558_v40 = vpop.xlane.xlu1 %557  ;;  %v5022_v44 = vpop.xlane.xlu0 %554  ;;  %v2790_v58 = vcombine.low %v2782_v21, %v2789_v22  ;;  %v1110_v48 = vrot.slane %v4994_v14, %v4917_v60  ;;  %v1117_v49 = vrot.slane %v4994_v14, %v4920_v61  ;;  %v1124_v53 = vrot.slane %v4994_v14, %v4923_v3 }
  0xef   : > { %v1243_v9 = vrot.slane %v558_v40, %v4914_v59  ;;  %v1250_v10 = vrot.slane %v558_v40, %v4917_v60  ;;  %v1257_v11 = vrot.slane %v558_v40, %v4920_v61  ;;  %v1264_v16 = vrot.slane %v558_v40, %v4923_v3  ;;  %3660 = vperm.xlu1 %4381, %v2671_v45  }
  0xf0   : > { %v2816_v62 = vrot.slane %v2808_v50, %v4934_v28  ;;  %v2823_v63 = vrot.slane %v2809_v51, %v4934_v28  ;;  %3681 = vperm.xlu0 %4380, %v2790_v58   ;;  %v2705_v42 = vcombine.low %v2697_v46, %v2704_v39  ;;  %v2731_v21 = vrot.slane %v2723_v31, %v4934_v28 }
  0xf1   : > { %v2842_v13 = vcombine.low %v1243_v9, %v1250_v10  ;;  %v2843_v18 = vcombine.low %v1257_v11, %v1264_v16  ;;  %v2738_v22 = vrot.slane %v2724_v35, %v4934_v28  ;;  %v1159_v50 = vrot.slane %v5008_v37, %v4914_v59 }
  0xf2   : > { %v564_v6 = vpop.xlane.xlu1 %563  ;;  %v5036_v7 = vpop.xlane.xlu0 %560  ;;  %v2824_v33 = vcombine.low %v2816_v62, %v2823_v63  ;;  %v1166_v51 = vrot.slane %v5008_v37, %v4917_v60  ;;  %v2757_v62 = vcombine.low %v1103_v20, %v1110_v48  ;;  %v2758_v63 = vcombine.low %v1117_v49, %v1124_v53 }
  0xf3   : > { %v1299_v8 = vrot.slane %v564_v6, %v4914_v59  ;;  %v1306_v12 = vrot.slane %v564_v6, %v4917_v60  ;;  %v1313_v19 = vrot.slane %v564_v6, %v4920_v61  ;;  %v1320_v27 = vrot.slane %v564_v6, %v4923_v3  ;;  %3663 = vperm.xlu1 %4381, %v2688_v32  }
  0xf4   : > { %v2850_v34 = vrot.slane %v2842_v13, %v4934_v28  ;;  %v2857_v38 = vrot.slane %v2843_v18, %v4934_v28  ;;  %3687 = vperm.xlu0 %4380, %v2824_v33   ;;  %v2739_v11 = vcombine.low %v2731_v21, %v2738_v22  ;;  %v1173_v1 = vrot.slane %v5008_v37, %v4920_v61 }
  0xf5   : > { %v2876_v29 = vcombine.low %v1299_v8, %v1306_v12  ;;  %v2877_v30 = vcombine.low %v1313_v19, %v1320_v27  ;;  %v1180_v2 = vrot.slane %v5008_v37, %v4923_v3  ;;  %v5084_v13 = vand.u32 127, %v764_v25 }
  0xf6   : > { %v570_v23 = vpop.xlane.xlu1 %569  ;;  %v5048_v24 = vpop.xlane.xlu0 %566  ;;  %v2858_v55 = vcombine.low %v2850_v34, %v2857_v38  ;;  %v2765_v12 = vrot.slane %v2757_v62, %v4934_v28  ;;  %v2772_v19 = vrot.slane %v2758_v63, %v4934_v28  ;;  %v2791_v33 = vcombine.low %v1159_v50, %v1166_v51 }
  0xf7   : > { %v1355_v36 = vrot.slane %v570_v23, %v4914_v59  ;;  %v1362_v41 = vrot.slane %v570_v23, %v4917_v60  ;;  %v1369_v47 = vrot.slane %v570_v23, %v4920_v61  ;;  %v1376_v54 = vrot.slane %v570_v23, %v4923_v3  ;;  %3666 = vperm.xlu1 %4381, %v2705_v42  }
  0xf8   : > { %v2884_v4 = vrot.slane %v2876_v29, %v4934_v28  ;;  %v2891_v5 = vrot.slane %v2877_v30, %v4934_v28  ;;  %3693 = vperm.xlu0 %4380, %v2858_v55   ;;  %v2773_v34 = vcombine.low %v2765_v12, %v2772_v19  ;;  %v5095_v38 = vadd.s32 4294967288, %v5084_v13 }
  0xf9   : > { %v2910_v26 = vcombine.low %v1355_v36, %v1362_v41  ;;  %v2911_v40 = vcombine.low %v1369_v47, %v1376_v54  ;;  %v1215_v39 = vrot.slane %v5022_v44, %v4914_v59  ;;  %v1222_v23 = vrot.slane %v5022_v44, %v4917_v60 }
  0xfa   : > { %v576_v15 = vpop.xlane.xlu1 %575  ;;  %v5062_v17 = vpop.xlane.xlu0 %572  ;;  %v2892_v10 = vcombine.low %v2884_v4, %v2891_v5  ;;  %v1229_v29 = vrot.slane %v5022_v44, %v4920_v61  ;;  %v1236_v30 = vrot.slane %v5022_v44, %v4923_v3  ;;  %v1271_v31 = vrot.slane %v5036_v7, %v4914_v59 }
  0xfb   : > { %v1411_v14 = vrot.slane %v576_v15, %v4914_v59  ;;  %v1418_v45 = vrot.slane %v576_v15, %v4917_v60  ;;  %v1425_v9 = vrot.slane %v576_v15, %v4920_v61  ;;  %v2918_v16 = vrot.slane %v2910_v26, %v4934_v28  ;;  %3672 = vperm.xlu1 %4381, %v2739_v11  }
  0xfc   : > { %v1432_v52 = vrot.slane %v576_v15, %v4923_v3  ;;  %v2925_v58 = vrot.slane %v2911_v40, %v4934_v28  ;;  %3699 = vperm.xlu0 %4380, %v2892_v10   ;;  %v1278_v35 = vrot.slane %v5036_v7, %v4917_v60  ;;  %v2792_v41 = vcombine.low %v1173_v1, %v1180_v2 }
  0xfd   : > { %v2944_v0 = vcombine.low %v1411_v14, %v1418_v45  ;;  %v1285_v47 = vrot.slane %v5036_v7, %v4920_v61  ;;  %v2799_v48 = vrot.slane %v2791_v33, %v4934_v28  ;;  %v1292_v55 = vrot.slane %v5036_v7, %v4923_v3 }
  0xfe   : > { %v582_v56 = vpop.xlane.xlu1 %581  ;;  %v5075_v57 = vpop.xlane.xlu0 %578  ;;  %v2926_v8 = vcombine.low %v2918_v16, %v2925_v58  ;;  %v2945_v37 = vcombine.low %v1425_v9, %v1432_v52  ;;  %v2806_v4 = vrot.slane %v2792_v41, %v4934_v28  ;;  %v5121_v5 = vadd.s32 4294967280, %v5084_v13 }
  0xff   : > { %v1467_v6 = vrot.slane %v582_v56, %v4914_v59  ;;  %v1474_v18 = vrot.slane %v582_v56, %v4917_v60  ;;  %v1481_v20 = vrot.slane %v582_v56, %v4920_v61  ;;  %v1488_v27 = vrot.slane %v582_v56, %v4923_v3  ;;  %3678 = vperm.xlu1 %4381, %v2773_v34  }
 0x100   : > { %3705 = vperm.xlu0 %4380, %v2926_v8   ;;  %v2952_v25 = vrot.slane %v2944_v0, %v4934_v28  ;;  %v2959_v36 = vrot.slane %v2945_v37, %v4934_v28  ;;  %v1327_v15 = vrot.slane %v5048_v24, %v4914_v59  ;;  %v1334_v21 = vrot.slane %v5048_v24, %v4917_v60 }
 0x101   : > { %v2978_v44 = vcombine.low %v1467_v6, %v1474_v18  ;;  %v2979_v54 = vcombine.low %v1481_v20, %v1488_v27  ;;  %v1341_v22 = vrot.slane %v5048_v24, %v4920_v61  ;;  %v2807_v45 = vcombine.low %v2799_v48, %v2806_v4 }
 0x102   : > { %v588_v32 = vpop.xlane.xlu1 %587  ;;  %v5091_v46 = vpop.xlane.xlu0 %584  ;;  %v2960_v42 = vcombine.low %v2952_v25, %v2959_v36  ;;  %v2825_v9 = vcombine.low %v1215_v39, %v1222_v23  ;;  %v2826_v10 = vcombine.low %v1229_v29, %v1236_v30  ;;  %v1348_v52 = vrot.slane %v5048_v24, %v4923_v3 }
 0x103   : > { %v1523_v26 = vrot.slane %v588_v32, %v4914_v59  ;;  %v1530_v40 = vrot.slane %v588_v32, %v4917_v60  ;;  %v1537_v7 = vrot.slane %v588_v32, %v4920_v61  ;;  %v1544_v14 = vrot.slane %v588_v32, %v4923_v3  ;;  %3684 = vperm.xlu1 %4381, %v2807_v45  }
 0x104   : > { %3711 = vperm.xlu0 %4380, %v2960_v42   ;;  %v2986_v50 = vrot.slane %v2978_v44, %v4934_v28  ;;  %v2993_v51 = vrot.slane %v2979_v54, %v4934_v28  ;;  %v1383_v56 = vrot.slane %v5062_v17, %v4914_v59  ;;  %v1390_v58 = vrot.slane %v5062_v17, %v4917_v60 }
 0x105   : > { %v1439_v62 = vrot.slane %v5075_v57, %v4914_v59  ;;  %v1446_v63 = vrot.slane %v5075_v57, %v4917_v60  ;;  %v2833_v1 = vrot.slane %v2825_v9, %v4934_v28  ;;  %v2840_v2 = vrot.slane %v2826_v10, %v4934_v28 }
 0x106   : > { %v5113_v49 = vpop.xlane.xlu1 %593  ;;  %v5115_v53 = vpop.xlane.xlu0 %590  ;;  %v2994_v0 = vcombine.low %v2986_v50, %v2993_v51  ;;  %v1397_v24 = vrot.slane %v5062_v17, %v4920_v61  ;;  %v1453_v6 = vrot.slane %v5075_v57, %v4920_v61  ;;  %v1460_v18 = vrot.slane %v5075_v57, %v4923_v3 }
 0x107   : > { %v1579_v8 = vrot.slane %v5113_v49, %v4914_v59  ;;  %v1586_v12 = vrot.slane %v5113_v49, %v4917_v60  ;;  %v2841_v19 = vcombine.low %v2833_v1, %v2840_v2  ;;  %v3012_v20 = vcombine.low %v1523_v26, %v1530_v40 }
 0x108   : > { %3717 = vperm.xlu0 %4380, %v2994_v0   ;;  %v3013_v27 = vcombine.low %v1537_v7, %v1544_v14  ;;  %v1593_v33 = vrot.slane %v5113_v49, %v4920_v61  ;;  %v1600_v57 = vrot.slane %v5113_v49, %v4923_v3  ;;  %v2859_v34 = vcombine.low %v1271_v31, %v1278_v35 }
 0x109   : > { %v2860_v25 = vcombine.low %v1285_v47, %v1292_v55  ;;  %v1404_v39 = vrot.slane %v5062_v17, %v4923_v3  ;;  %v5171_v23 = vcombine.low %v1439_v62, %v1446_v63  ;;  %3690 = vperm.xlu1 %4381, %v2841_v19   ;;  %v3020_v29 = vrot.slane %v3012_v20, %v4934_v28 }
 0x10a   : > { %v5135_v11 = vpop.xlane.xlu1 %599  ;;  %v5137_v16 = vpop.xlane.xlu0 %596  ;;  %v3027_v30 = vrot.slane %v3013_v27, %v4934_v28  ;;  %v1495_v36 = vrot.slane %v5091_v46, %v4914_v59  ;;  %v1502_v41 = vrot.slane %v5091_v46, %v4917_v60  ;;  %v2867_v48 = vrot.slane %v2859_v34, %v4934_v28 }
 0x10b   : > { %v2874_v31 = vrot.slane %v2860_v25, %v4934_v28  ;;  %v5181_v35 = vcombine.low %v1453_v6, %v1460_v18  ;;  %v1509_v47 = vrot.slane %v5091_v46, %v4920_v61  ;;  %v1635_v49 = vrot.slane %v5135_v11, %v4914_v59 }
 0x10c   : > { %v3028_v44 = vcombine.low %v3020_v29, %v3027_v30  ;;  %v1642_v42 = vrot.slane %v5135_v11, %v4917_v60  ;;  %v3046_v26 = vcombine.low %v1579_v8, %v1586_v12  ;;  %v3047_v40 = vcombine.low %v1593_v33, %v1600_v57 }
 0x10d   : > { %v2875_v4 = vcombine.low %v2867_v48, %v2874_v31  ;;  %v1649_v7 = vrot.slane %v5135_v11, %v4920_v61  ;;  %v1656_v14 = vrot.slane %v5135_v11, %v4923_v3  ;;  %v2893_v45 = vcombine.low %v1327_v15, %v1334_v21 }
 0x10e   : > { %v5161_v32 = vpop.xlane.xlu1 %605  ;;  %v5163_v37 = vpop.xlane.xlu0 %602  ;;  %3723 = vperm.xlu0 %4380, %v3028_v44   ;;  %v2894_v50 = vcombine.low %v1341_v22, %v1348_v52  ;;  %v1516_v51 = vrot.slane %v5091_v46, %v4923_v3  ;;  %v5199_v9 = vcombine.low %v1495_v36, %v1502_v41  ;;  %v3054_v10 = vrot.slane %v3046_v26, %v4934_v28 }
 0x10f   : > { %3696 = vperm.xlu1 %4381, %v2875_v4   ;;  %v3061_v62 = vrot.slane %v3047_v40, %v4934_v28  ;;  %v1551_v63 = vrot.slane %v5115_v53, %v4914_v59  ;;  %v1558_v0 = vrot.slane %v5115_v53, %v4917_v60  ;;  %v2901_v11 = vrot.slane %v2893_v45, %v4934_v28 }
 0x110   : > { %v2908_v15 = vrot.slane %v2894_v50, %v4934_v28  ;;  %v1565_v22 = vrot.slane %v5115_v53, %v4920_v61  ;;  %v1572_v52 = vrot.slane %v5115_v53, %v4923_v3  ;;  %v1607_v1 = vrot.slane %v5137_v16, %v4914_v59 }
 0x111   : > { %v3062_v2 = vcombine.low %v3054_v10, %v3061_v62  ;;  %v1614_v6 = vrot.slane %v5137_v16, %v4917_v60  ;;  %v3080_v8 = vcombine.low %v1635_v49, %v1642_v42  ;;  %v3081_v12 = vcombine.low %v1649_v7, %v1656_v14 }
 0x112   : > { %v5187_v54 = vpop.xlane.xlu1 %611  ;;  %v5189_v55 = vpop.xlane.xlu0 %608  ;;  %v2909_v18 = vcombine.low %v2901_v11, %v2908_v15  ;;  %v1691_v19 = vrot.slane %v5161_v32, %v4914_v59  ;;  %v1698_v20 = vrot.slane %v5161_v32, %v4917_v60  ;;  %v2927_v53 = vcombine.low %v1383_v56, %v1390_v58 }
 0x113   : > { %3729 = vperm.xlu0 %4380, %v3062_v2   ;;  %v2928_v27 = vcombine.low %v1397_v24, %v1404_v39  ;;  %v1705_v33 = vrot.slane %v5161_v32, %v4920_v61  ;;  %v1712_v57 = vrot.slane %v5161_v32, %v4923_v3  ;;  %v3088_v34 = vrot.slane %v3080_v8, %v4934_v28 }
 0x114   : > { %3702 = vperm.xlu1 %4381, %v2909_v18   ;;  %v3095_v25 = vrot.slane %v3081_v12, %v4934_v28  ;;  %v2996_v36 = vcombine.low %v1509_v47, %v1516_v51  ;;  %v5241_v41 = vcombine.low %v1551_v63, %v1558_v0  ;;  %v2935_v17 = vrot.slane %v2927_v53, %v4934_v28 }
 0x115   : > { %v2942_v56 = vrot.slane %v2928_v27, %v4934_v28  ;;  %v5245_v58 = vcombine.low %v1565_v22, %v1572_v52  ;;  %v1621_v24 = vrot.slane %v5137_v16, %v4920_v61  ;;  %v1628_v32 = vrot.slane %v5137_v16, %v4923_v3 }
 0x116   : > { %v5209_v21 = vpop.xlane.xlu1 %617  ;;  %v5211_v46 = vpop.xlane.xlu0 %614  ;;  %v3096_v39 = vcombine.low %v3088_v34, %v3095_v25  ;;  %v5251_v48 = vcombine.low %v1607_v1, %v1614_v6  ;;  %v1747_v31 = vrot.slane %v5187_v54, %v4914_v59  ;;  %v1754_v47 = vrot.slane %v5187_v54, %v4917_v60 }
 0x117   : > { %v2943_v49 = vcombine.low %v2935_v17, %v2942_v56  ;;  %v1761_v44 = vrot.slane %v5187_v54, %v4920_v61  ;;  %v3114_v42 = vcombine.low %v1691_v19, %v1698_v20  ;;  %v3115_v4 = vcombine.low %v1705_v33, %v1712_v57 }
 0x118   : > { %3735 = vperm.xlu0 %4380, %v3096_v39   ;;  %v2969_v26 = vrot.slane %v5171_v23, %v4934_v28  ;;  %v1768_v7 = vrot.slane %v5187_v54, %v4923_v3  ;;  %v1803_v14 = vrot.slane %v5209_v21, %v4914_v59  ;;  %v1810_v45 = vrot.slane %v5209_v21, %v4917_v60 }
 0x119   : > { %3708 = vperm.xlu1 %4381, %v2943_v49   ;;  %v2976_v50 = vrot.slane %v5181_v35, %v4934_v28  ;;  %v1817_v23 = vrot.slane %v5209_v21, %v4920_v61  ;;  %v1824_v51 = vrot.slane %v5209_v21, %v4923_v3  ;;  %v3122_v10 = vrot.slane %v3114_v42, %v4934_v28 }
 0x11a   : > { %v5237_v29 = vpop.xlane.xlu1 %623  ;;  %v5239_v30 = vpop.xlane.xlu0 %620  ;;  %v3129_v54 = vrot.slane %v3115_v4, %v4934_v28  ;;  %v1663_v62 = vrot.slane %v5163_v37, %v4914_v59  ;;  %v1670_v63 = vrot.slane %v5163_v37, %v4917_v60  ;;  %v1677_v0 = vrot.slane %v5163_v37, %v4920_v61 }
 0x11b   : > { %v2977_v35 = vcombine.low %v2969_v26, %v2976_v50  ;;  %v1684_v11 = vrot.slane %v5163_v37, %v4923_v3  ;;  %v1719_v15 = vrot.slane %v5189_v55, %v4914_v59  ;;  %v1726_v21 = vrot.slane %v5189_v55, %v4917_v60 }
 0x11c   : > { %v3130_v22 = vcombine.low %v3122_v10, %v3129_v54  ;;  %v1733_v2 = vrot.slane %v5189_v55, %v4920_v61  ;;  %v3148_v6 = vcombine.low %v1747_v31, %v1754_v47  ;;  %v3149_v18 = vcombine.low %v1761_v44, %v1768_v7 }
 0x11d   : > { %3714 = vperm.xlu1 %4381, %v2977_v35   ;;  %v3003_v37 = vrot.slane %v5199_v9, %v4934_v28  ;;  %v1740_v8 = vrot.slane %v5189_v55, %v4923_v3  ;;  %v3182_v12 = vcombine.low %v1803_v14, %v1810_v45  ;;  %v3183_v19 = vcombine.low %v1817_v23, %v1824_v51 }
 0x11e   : > { %v5261_v16 = vpop.xlane.xlu1 %629  ;;  %v5263_v40 = vpop.xlane.xlu0 %626  ;;  %3741 = vperm.xlu0 %4380, %v3130_v22   ;;  %v3010_v20 = vrot.slane %v2996_v36, %v4934_v28  ;;  %v1775_v53 = vrot.slane %v5211_v46, %v4914_v59  ;;  %v1782_v27 = vrot.slane %v5211_v46, %v4917_v60  ;;  %v3156_v33 = vrot.slane %v3148_v6, %v4934_v28 }
 0x11f   : > { %v3163_v57 = vrot.slane %v3149_v18, %v4934_v28  ;;  %v3064_v34 = vcombine.low %v1621_v24, %v1628_v32  ;;  %v1789_v9 = vrot.slane %v5211_v46, %v4920_v61  ;;  %v1796_v55 = vrot.slane %v5211_v46, %v4923_v3 }
 0x120   : > { %v3011_v25 = vcombine.low %v3003_v37, %v3010_v20  ;;  %v3097_v56 = vcombine.low %v1663_v62, %v1670_v63  ;;  %v1859_v39 = vrot.slane %v5237_v29, %v4914_v59  ;;  %v1866_v31 = vrot.slane %v5237_v29, %v4917_v60 }
 0x121   : > { %v3164_v47 = vcombine.low %v3156_v33, %v3163_v57  ;;  %v3098_v24 = vcombine.low %v1677_v0, %v1684_v11  ;;  %v3190_v32 = vrot.slane %v3182_v12, %v4934_v28  ;;  %v3197_v49 = vrot.slane %v3183_v19, %v4934_v28 }
 0x122   : > { %v5291_v52 = vpop.xlane.xlu1 %635  ;;  %v5293_v1 = vpop.xlane.xlu0 %632  ;;  %3720 = vperm.xlu1 %4381, %v3011_v25   ;;  %v3037_v46 = vrot.slane %v5241_v41, %v4934_v28  ;;  %v5324_v44 = vcombine.low %v1719_v15, %v1726_v21  ;;  %v5326_v42 = vcombine.low %v1733_v2, %v1740_v8  ;;  %v5328_v4 = vcombine.low %v1775_v53, %v1782_v27 }
 0x123   : > { %3747 = vperm.xlu0 %4380, %v3164_v47   ;;  %v3044_v26 = vrot.slane %v5245_v58, %v4934_v28  ;;  %v5332_v7 = vcombine.low %v1789_v9, %v1796_v55  ;;  %v1873_v14 = vrot.slane %v5237_v29, %v4920_v61  ;;  %v1880_v45 = vrot.slane %v5237_v29, %v4923_v3 }
 0x124   : > { %v3198_v50 = vcombine.low %v3190_v32, %v3197_v49  ;;  %v5342_v51 = vcombine.low %v1859_v39, %v1866_v31  ;;  %v1831_v10 = vrot.slane %v5239_v30, %v4914_v59  ;;  %v1838_v58 = vrot.slane %v5239_v30, %v4917_v60 }
 0x125   : > { %v3045_v54 = vcombine.low %v3037_v46, %v3044_v26  ;;  %v1845_v62 = vrot.slane %v5239_v30, %v4920_v61  ;;  %v1852_v29 = vrot.slane %v5239_v30, %v4923_v3  ;;  %v3071_v63 = vrot.slane %v5251_v48, %v4934_v28 }
 0x126   : > { %v5312_v17 = vpop.xlane.xlu1 %641  ;;  %v5314_v36 = vpop.xlane.xlu0 %638  ;;  %v3078_v0 = vrot.slane %v3064_v34, %v4934_v28  ;;  %v1915_v35 = vrot.slane %v5261_v16, %v4914_v59  ;;  %v1922_v11 = vrot.slane %v5261_v16, %v4917_v60  ;;  %v1929_v15 = vrot.slane %v5261_v16, %v4920_v61 }
 0x127   : > { %3753 = vperm.xlu0 %4380, %v3198_v50   ;;  %3726 = vperm.xlu1 %4381, %v3045_v54   ;;  %v5362_v21 = vadd.s32 4294967272, %v5084_v13  ;;  %v1936_v30 = vrot.slane %v5261_v16, %v4923_v3  ;;  %v1887_v48 = vrot.slane %v5263_v40, %v4914_v59  ;;  %v1894_v22 = vrot.slane %v5263_v40, %v4917_v60 }
 0x128   : > { %v1901_v2 = vrot.slane %v5263_v40, %v4920_v61  ;;  %v1908_v37 = vrot.slane %v5263_v40, %v4923_v3  ;;  %v1971_v8 = vrot.slane %v5291_v52, %v4914_v59  ;;  %v1978_v16 = vrot.slane %v5291_v52, %v4917_v60 }
 0x129   : > { %v3079_v12 = vcombine.low %v3071_v63, %v3078_v0  ;;  %v1985_v19 = vrot.slane %v5291_v52, %v4920_v61  ;;  %v1992_v20 = vrot.slane %v5291_v52, %v4923_v3  ;;  %v3105_v53 = vrot.slane %v3097_v56, %v4934_v28 }
 0x12a   : > { %v5338_v41 = vpop.xlane.xlu1 %647  ;;  %v5340_v23 = vpop.xlane.xlu0 %644  ;;  %v3112_v27 = vrot.slane %v3098_v24, %v4934_v28  ;;  %v5384_v33 = vcombine.low %v1873_v14, %v1880_v45  ;;  %v3199_v40 = vcombine.low %v1831_v10, %v1838_v58  ;;  %v1943_v57 = vrot.slane %v5293_v1, %v4914_v59 }
 0x12b   : > { %v1950_v34 = vrot.slane %v5293_v1, %v4917_v60  ;;  %3732 = vperm.xlu1 %4381, %v3079_v12   ;;  %v3200_v9 = vcombine.low %v1845_v62, %v1852_v29  ;;  %v5390_v55 = vcombine.low %v1915_v35, %v1922_v11  ;;  %v5392_v25 = vcombine.low %v1929_v15, %v1936_v30 }
 0x12c   : > { %v5394_v52 = vcombine.low %v1887_v48, %v1894_v22  ;;  %v5396_v39 = vcombine.low %v1901_v2, %v1908_v37  ;;  %v5398_v31 = vcombine.low %v1971_v8, %v1978_v16  ;;  %v1957_v47 = vrot.slane %v5293_v1, %v4920_v61 }
 0x12d   : > { %v3113_v24 = vcombine.low %v3105_v53, %v3112_v27  ;;  %v5402_v49 = vcombine.low %v1985_v19, %v1992_v20  ;;  %v3139_v46 = vrot.slane %v5324_v44, %v4934_v28  ;;  %v3146_v26 = vrot.slane %v5326_v42, %v4934_v28 }
 0x12e   : > { %v654_v6 = vpop.xlane.xlu1 %653  ;;  %v651_v18 = vpop.xlane.xlu0 %650  ;;  %v1964_v45 = vrot.slane %v5293_v1, %v4923_v3  ;;  %v5411_v50 = vcombine.low %v1943_v57, %v1950_v34  ;;  %v3173_v35 = vrot.slane %v5328_v4, %v4934_v28  ;;  %v3180_v48 = vrot.slane %v5332_v7, %v4934_v28 }
 0x12f   : > { %v2139_v14 = vrot.slane %v654_v6, %v4914_v59  ;;  %3738 = vperm.xlu1 %4381, %v3113_v24   ;;  %v2146_v10 = vrot.slane %v654_v6, %v4917_v60  ;;  %v2153_v58 = vrot.slane %v654_v6, %v4920_v61  ;;  %v3147_v54 = vcombine.low %v3139_v46, %v3146_v26 }
 0x130   : > { %v2160_v62 = vrot.slane %v654_v6, %v4923_v3  ;;  %v2111_v44 = vrot.slane %v651_v18, %v4914_v59  ;;  %v2118_v29 = vrot.slane %v651_v18, %v4917_v60  ;;  %v2125_v63 = vrot.slane %v651_v18, %v4920_v61 }
 0x131   : > { %v3386_v42 = vcombine.low %v2139_v14, %v2146_v10  ;;  %v2132_v0 = vrot.slane %v651_v18, %v4923_v3  ;;  %v3181_v16 = vcombine.low %v3173_v35, %v3180_v48  ;;  %v3207_v27 = vrot.slane %v3199_v40, %v4934_v28 }
 0x132   : > { %v657_v56 = vpop.xlane.xlu0 %656  ;;  %v660_v32 = vpop.xlane.xlu1 %659  ;;  %v3387_v15 = vcombine.low %v2153_v58, %v2160_v62  ;;  %v3369_v30 = vcombine.low %v2111_v44, %v2118_v29  ;;  %v3214_v34 = vrot.slane %v3200_v9, %v4934_v28 }
 0x133   : > { %v2195_v22 = vrot.slane %v660_v32, %v4914_v59  ;;  %3744 = vperm.xlu1 %4381, %v3147_v54   ;;  %v3370_v2 = vcombine.low %v2125_v63, %v2132_v0  ;;  %v2202_v6 = vrot.slane %v660_v32, %v4917_v60  ;;  %v2209_v37 = vrot.slane %v660_v32, %v4920_v61 }
 0x134   : > { %v2216_v8 = vrot.slane %v660_v32, %v4923_v3  ;;  %v2167_v4 = vrot.slane %v657_v56, %v4914_v59  ;;  %v2174_v12 = vrot.slane %v657_v56, %v4917_v60  ;;  %v2181_v19 = vrot.slane %v657_v56, %v4920_v61 }
 0x135   : > { %v3420_v20 = vcombine.low %v2195_v22, %v2202_v6  ;;  %v2188_v53 = vrot.slane %v657_v56, %v4923_v3  ;;  %v3215_v54 = vcombine.low %v3207_v27, %v3214_v34  ;;  %v3394_v29 = vrot.slane %v3386_v42, %v4934_v28 }
 0x136   : > { %v663_v11 = vpop.xlane.xlu0 %662  ;;  %v666_v18 = vpop.xlane.xlu1 %665  ;;  %v3421_v7 = vcombine.low %v2209_v37, %v2216_v8  ;;  %v3403_v57 = vcombine.low %v2167_v4, %v2174_v12  ;;  %v3401_v63 = vrot.slane %v3387_v15, %v4934_v28  ;;  %v3377_v35 = vrot.slane %v3369_v30, %v4934_v28 }
 0x137   : > { %v2251_v24 = vrot.slane %v666_v18, %v4914_v59  ;;  %v2258_v32 = vrot.slane %v666_v18, %v4917_v60  ;;  %3750 = vperm.xlu1 %4381, %v3181_v16   ;;  %v3404_v46 = vcombine.low %v2181_v19, %v2188_v53  ;;  %v2265_v26 = vrot.slane %v666_v18, %v4920_v61 }
 0x138   : > { %v2272_v14 = vrot.slane %v666_v18, %v4923_v3  ;;  %v2223_v10 = vrot.slane %v663_v11, %v4914_v59  ;;  %v2230_v40 = vrot.slane %v663_v11, %v4917_v60  ;;  %v2237_v62 = vrot.slane %v663_v11, %v4920_v61 }
 0x139   : > { %v3454_v56 = vcombine.low %v2251_v24, %v2258_v32  ;;  %v2244_v44 = vrot.slane %v663_v11, %v4923_v3  ;;  %v3384_v48 = vrot.slane %v3370_v2, %v4934_v28  ;;  %v3402_v8 = vcombine.low %v3394_v29, %v3401_v63 }
 0x13a   : > { %v669_v58 = vpop.xlane.xlu0 %668  ;;  %v3455_v9 = vcombine.low %v2265_v26, %v2272_v14  ;;  %v3437_v0 = vcombine.low %v2223_v10, %v2230_v40  ;;  %v672_v6 = vpop.xlane.xlu1 %671  ;;  %v3428_v15 = vrot.slane %v3420_v20, %v4934_v28  ;;  %v3435_v4 = vrot.slane %v3421_v7, %v4934_v28 }
 0x13b   : > { %v2279_v22 = vrot.slane %v669_v58, %v4914_v59  ;;  %3756 = vperm.xlu1 %4381, %v3215_v54   ;;  %v3438_v37 = vcombine.low %v2237_v62, %v2244_v44  ;;  %v2286_v18 = vrot.slane %v669_v58, %v4917_v60  ;;  %v2293_v16 = vrot.slane %v669_v58, %v4920_v61 }
 0x13c   : > { %v3385_v11 = vcombine.low %v3377_v35, %v3384_v48  ;;  %v2300_v42 = vrot.slane %v669_v58, %v4923_v3  ;;  %v3411_v2 = vrot.slane %v3403_v57, %v4934_v28  ;;  %v3418_v12 = vrot.slane %v3404_v46, %v4934_v28 }
 0x13d   : > { %v3471_v30 = vcombine.low %v2279_v22, %v2286_v18  ;;  %v2307_v19 = vrot.slane %v672_v6, %v4914_v59  ;;  %v3436_v34 = vcombine.low %v3428_v15, %v3435_v4  ;;  %v2314_v24 = vrot.slane %v672_v6, %v4917_v60 }
 0x13e   : > { %v675_v53 = vpop.xlane.xlu0 %674  ;;  %3786 = vperm.xlu0 %4380, %v3385_v11   ;;  %v3472_v27 = vcombine.low %v2293_v16, %v2300_v42  ;;  %v2321_v32 = vrot.slane %v672_v6, %v4920_v61  ;;  %v3419_v26 = vcombine.low %v3411_v2, %v3418_v12  ;;  %v2328_v20 = vrot.slane %v672_v6, %v4923_v3 }
 0x13f   : > { %3789 = vperm.xlu1 %4381, %v3402_v8   ;;  %v3462_v7 = vrot.slane %v3454_v56, %v4934_v28  ;;  %v3469_v57 = vrot.slane %v3455_v9, %v4934_v28  ;;  %v2027_v46 = vrot.slane %v5312_v17, %v4914_v59  ;;  %v3445_v14 = vrot.slane %v3437_v0, %v4934_v28  ;;  %v678_v0 = vpop.xlane.xlu1 %677 }
 0x140   : > { %v3452_v10 = vrot.slane %v3438_v37, %v4934_v28  ;;  %v2335_v58 = vrot.slane %v675_v53, %v4914_v59  ;;  %v5471_v54 = vcombine.low %v1957_v47, %v1964_v45  ;;  %v2034_v56 = vrot.slane %v5312_v17, %v4917_v60 }
 0x141   : > { %v2342_v40 = vrot.slane %v675_v53, %v4917_v60  ;;  %v2349_v62 = vrot.slane %v675_v53, %v4920_v61  ;;  %v3488_v9 = vcombine.low %v2307_v19, %v2314_v24  ;;  %v3489_v44 = vcombine.low %v2321_v32, %v2328_v20 }
 0x142   : > { %3792 = vperm.xlu0 %4380, %v3419_v26   ;;  %v3453_v29 = vcombine.low %v3445_v14, %v3452_v10  ;;  %v2356_v63 = vrot.slane %v675_v53, %v4923_v3  ;;  %v2041_v35 = vrot.slane %v5312_v17, %v4920_v61  ;;  %v3470_v1 = vcombine.low %v3462_v7, %v3469_v57  ;;  %v681_v8 = vpop.xlane.xlu0 %680 }
 0x143   : > { %3795 = vperm.xlu1 %4381, %v3436_v34   ;;  %v3479_v47 = vrot.slane %v3471_v30, %v4934_v28  ;;  %v3486_v45 = vrot.slane %v3472_v27, %v4934_v28  ;;  %v2048_v48 = vrot.slane %v5312_v17, %v4923_v3  ;;  %v3505_v22 = vcombine.low %v2335_v58, %v2342_v40 }
 0x144   : > { %v3224_v6 = vrot.slane %v5342_v51, %v4934_v28  ;;  %v3231_v37 = vrot.slane %v5384_v33, %v4934_v28  ;;  %v3506_v18 = vcombine.low %v2349_v62, %v2356_v63  ;;  %v2363_v16 = vrot.slane %v678_v0, %v4914_v59  ;;  %v684_v51 = vpop.xlane.xlu1 %683 }
 0x145   : > { %v2370_v11 = vrot.slane %v678_v0, %v4917_v60  ;;  %v2377_v42 = vrot.slane %v678_v0, %v4920_v61  ;;  %v3487_v15 = vcombine.low %v3479_v47, %v3486_v45  ;;  %v2384_v4 = vrot.slane %v678_v0, %v4923_v3 }
 0x146   : > { %3798 = vperm.xlu0 %4380, %v3453_v29   ;;  %v3496_v17 = vrot.slane %v3488_v9, %v4934_v28  ;;  %v3503_v30 = vrot.slane %v3489_v44, %v4934_v28  ;;  %v5494_v2 = vcombine.low %v2027_v46, %v2034_v56  ;;  %v1999_v33 = vrot.slane %v5314_v36, %v4914_v59  ;;  %v687_v10 = vpop.xlane.xlu0 %686 }
 0x147   : > { %v2006_v12 = vrot.slane %v5314_v36, %v4917_v60  ;;  %v2013_v19 = vrot.slane %v5314_v36, %v4920_v61  ;;  %3801 = vperm.xlu1 %4381, %v3470_v1   ;;  %v3241_v53 = vrot.slane %v5394_v52, %v4934_v28  ;;  %v3248_v27 = vrot.slane %v5396_v39, %v4934_v28 }
 0x148   : > { %v2391_v34 = vrot.slane %v681_v8, %v4914_v59  ;;  %v2398_v24 = vrot.slane %v681_v8, %v4917_v60  ;;  %v3232_v32 = vcombine.low %v3224_v6, %v3231_v37  ;;  %v3522_v26 = vcombine.low %v2363_v16, %v2370_v11  ;;  %v690_v63 = vpop.xlane.xlu1 %689 }
 0x149   : > { %v2405_v20 = vrot.slane %v681_v8, %v4920_v61  ;;  %v2412_v7 = vrot.slane %v681_v8, %v4923_v3  ;;  %v3523_v57 = vcombine.low %v2377_v42, %v2384_v4  ;;  %v3504_v46 = vcombine.low %v3496_v17, %v3503_v30 }
 0x14a   : > { %3804 = vperm.xlu0 %4380, %v3487_v15   ;;  %v3513_v14 = vrot.slane %v3505_v22, %v4934_v28  ;;  %v3520_v52 = vrot.slane %v3506_v18, %v4934_v28  ;;  %v5512_v58 = vcombine.low %v2041_v35, %v2048_v48  ;;  %v2020_v39 = vrot.slane %v5314_v36, %v4923_v3  ;;  %v5542_v42 = vpop.xlane.xlu0 %692 }
 0x14b   : > { %v5516_v56 = vcombine.low %v1999_v33, %v2006_v12  ;;  %v2083_v40 = vrot.slane %v5338_v41, %v4914_v59  ;;  %3759 = vperm.xlu1 %4381, %v3232_v32   ;;  %v3249_v62 = vcombine.low %v3241_v53, %v3248_v27  ;;  %v3539_v9 = vcombine.low %v2391_v34, %v2398_v24 }
 0x14c   : > { %v3258_v44 = vrot.slane %v5390_v55, %v4934_v28  ;;  %v3265_v29 = vrot.slane %v5392_v25, %v4934_v28  ;;  %v3540_v0 = vcombine.low %v2405_v20, %v2412_v7  ;;  %v2419_v35 = vrot.slane %v684_v51, %v4914_v59  ;;  %v5550_v53 = vpop.xlane.xlu1 %695 }
 0x14d   : > { %v2426_v36 = vrot.slane %v684_v51, %v4917_v60  ;;  %v2433_v1 = vrot.slane %v684_v51, %v4920_v61  ;;  %v3521_v47 = vcombine.low %v3513_v14, %v3520_v52  ;;  %v2440_v45 = vrot.slane %v684_v51, %v4923_v3 }
 0x14e   : > { %3807 = vperm.xlu0 %4380, %v3504_v46   ;;  %v3530_v48 = vrot.slane %v3522_v26, %v4934_v28  ;;  %v3537_v22 = vrot.slane %v3523_v57, %v4934_v28  ;;  %v5530_v55 = vcombine.low %v2013_v19, %v2020_v39  ;;  %v2090_v25 = vrot.slane %v5338_v41, %v4917_v60 }
 0x14f   : > { %v2097_v6 = vrot.slane %v5338_v41, %v4920_v61  ;;  %v2055_v37 = vrot.slane %v5340_v23, %v4914_v59  ;;  %3762 = vperm.xlu1 %4381, %v3249_v62   ;;  %v2447_v8 = vrot.slane %v687_v10, %v4914_v59  ;;  %v2454_v18 = vrot.slane %v687_v10, %v4917_v60 }
 0x150   : > { %v2461_v16 = vrot.slane %v687_v10, %v4920_v61  ;;  %v2468_v11 = vrot.slane %v687_v10, %v4923_v3  ;;  %v3266_v15 = vcombine.low %v3258_v44, %v3265_v29  ;;  %v3556_v4 = vcombine.low %v2419_v35, %v2426_v36 }
 0x151   : > { %v3275_v17 = vrot.slane %v5411_v50, %v4934_v28  ;;  %v3282_v30 = vrot.slane %v5471_v54, %v4934_v28  ;;  %v3557_v51 = vcombine.low %v2433_v1, %v2440_v45  ;;  %v3538_v33 = vcombine.low %v3530_v48, %v3537_v22 }
 0x152   : > { %3810 = vperm.xlu0 %4380, %v3521_v47   ;;  %v3547_v12 = vrot.slane %v3539_v9, %v4934_v28  ;;  %v3554_v19 = vrot.slane %v3540_v0, %v4934_v28  ;;  %v2062_v27 = vrot.slane %v5340_v23, %v4917_v60  ;;  %v2069_v34 = vrot.slane %v5340_v23, %v4920_v61 }
 0x153   : > { %3765 = vperm.xlu1 %4381, %v3266_v15   ;;  %v2475_v50 = vrot.slane %v690_v63, %v4914_v59  ;;  %v2482_v54 = vrot.slane %v690_v63, %v4917_v60  ;;  %v3573_v24 = vcombine.low %v2447_v8, %v2454_v18  ;;  %v3574_v32 = vcombine.low %v2461_v16, %v2468_v11 }
 0x154   : > { %v2489_v26 = vrot.slane %v690_v63, %v4920_v61  ;;  %v2496_v20 = vrot.slane %v690_v63, %v4923_v3  ;;  %v3283_v7 = vcombine.low %v3275_v17, %v3282_v30  ;;  %v3292_v57 = vrot.slane %v5398_v31, %v4934_v28 }
 0x155   : > { %v3299_v46 = vrot.slane %v5402_v49, %v4934_v28  ;;  %v5566_v14 = vsub.s32 %v5084_v13, %v4911_v43  ;;  %v3555_v52 = vcombine.low %v3547_v12, %v3554_v19  ;;  %v3564_v39 = vrot.slane %v3556_v4, %v4934_v28 }
 0x156   : > { %3813 = vperm.xlu0 %4380, %v3538_v33   ;;  %v3571_v62 = vrot.slane %v3557_v51, %v4934_v28  ;;  %v5572_v9 = vsub.s32 %v5095_v38, %v4911_v43  ;;  %v2076_v31 = vrot.slane %v5340_v23, %v4923_v3  ;;  %v3590_v49 = vcombine.low %v2475_v50, %v2482_v54 }
 0x157   : > { %v3643_v10 = vpop.permute.xlu0 %3642  ;;  %3768 = vperm.xlu1 %4381, %v3283_v7   ;;  %v2503_v44 = vrot.slane %v5542_v42, %v4914_v59  ;;  %v2510_v29 = vrot.slane %v5542_v42, %v4917_v60  ;;  %v3591_v63 = vcombine.low %v2489_v26, %v2496_v20  ;;  %v2517_v0 = vrot.slane %v5542_v42, %v4920_v61 }
 0x158   : > { %v3309_v35 = vrot.slane %v5516_v56, %v4934_v28  ;;  %v3316_v38 = vrot.slane %v5530_v55, %v4934_v28  ;;  %v3300_v23 = vcombine.low %v3292_v57, %v3299_v46  ;;  %v3838_v1 = vrot.slane %v3643_v10, %v5566_v14 }
 0x159   : > { %v5590_v45 = vsub.s32 %v5121_v5, %v4911_v43  ;;  %v2524_v48 = vrot.slane %v5542_v42, %v4923_v3  ;;  %v3572_v22 = vcombine.low %v3564_v39, %v3571_v62  ;;  %v3581_v56 = vrot.slane %v3573_v24, %v4934_v28 }
 0x15a   : > { %v3646_v36 = vpop.permute.xlu1 %3645  ;;  %3816 = vperm.xlu0 %4380, %v3555_v52   ;;  %v3588_v55 = vrot.slane %v3574_v32, %v4934_v28  ;;  %v2104_v8 = vrot.slane %v5338_v41, %v4923_v3  ;;  %v3352_v18 = vcombine.low %v2083_v40, %v2090_v25  ;;  %v3335_v16 = vcombine.low %v2055_v37, %v2062_v27 }
 0x15b   : > { %v3843_v47 = vrot.slane %v3646_v36, %v5572_v9  ;;  %3771 = vperm.xlu1 %4381, %v3300_v23   ;;  %v3336_v11 = vcombine.low %v2069_v34, %v2076_v31  ;;  %v3607_v15 = vcombine.low %v2503_v44, %v2510_v29  ;;  %v3317_v42 = vcombine.low %v3309_v35, %v3316_v38 }
 0x15c   : > { %v3326_v4 = vrot.slane %v5494_v2, %v4934_v28  ;;  %v3333_v30 = vrot.slane %v5512_v58, %v4934_v28  ;;  %v5609_v33 = vsub.s32 %v5362_v21, %v4911_v43  ;;  %v3860_v40 = vadd.s32 4294967264, %v5084_v13 }
 0x15d   : > { %v3845_v5 = vsel %vm3844_vm1, %v3843_v47, %v3838_v1  ;;  %v3608_v25 = vcombine.low %v2517_v0, %v2524_v48  ;;  %v3589_v37 = vcombine.low %v3581_v56, %v3588_v55  ;;  %v3598_v12 = vrot.slane %v3590_v49, %v4934_v28 }
 0x15e   : > { %v3649_v17 = vpop.permute.xlu1 %3648  ;;  %3819 = vperm.xlu0 %4380, %v3572_v22   ;;  %v3605_v19 = vrot.slane %v3591_v63, %v4934_v28  ;;  %v3353_v2 = vcombine.low %v2097_v6, %v2104_v8  ;;  %v2531_v58 = vrot.slane %v5550_v53, %v4914_v59  ;;  %v2538_v21 = vrot.slane %v5550_v53, %v4917_v60 }
 0x15f   : > { %v3850_v51 = vrot.slane %v3649_v17, %v5590_v45  ;;  %3774 = vperm.xlu1 %4381, %v3317_v42   ;;  %v2545_v34 = vrot.slane %v5550_v53, %v4920_v61  ;;  %v2552_v50 = vrot.slane %v5550_v53, %v4923_v3  ;;  %v3343_v54 = vrot.slane %v3335_v16, %v4934_v28 }
 0x160   : > { %v3350_v41 = vrot.slane %v3336_v11, %v4934_v28  ;;  %v3334_v24 = vcombine.low %v3326_v4, %v3333_v30  ;;  %v5630_v32 = vsub.s32 %v3860_v40, %v4911_v43  ;;  %v3867_v60 = vadd.s32 4294967256, %v5084_v13 }
 0x161   : > { %v3852_v27 = vsel %vm3851_vm2, %v3850_v51, %v3845_v5  ;;  %v3606_v26 = vcombine.low %v3598_v12, %v3605_v19  ;;  %v3615_v61 = vrot.slane %v3607_v15, %v4934_v28  ;;  %v3622_v20 = vrot.slane %v3608_v25, %v4934_v28 }
 0x162   : > { %v3652_v6 = vpop.permute.xlu1 %3651  ;;  %3822 = vperm.xlu0 %4380, %v3589_v37   ;;  %v3624_v3 = vcombine.low %v2531_v58, %v2538_v21  ;;  %v3625_v7 = vcombine.low %v2545_v34, %v2552_v50  ;;  %v3351_v57 = vcombine.low %v3343_v54, %v3350_v41  ;;  %v3360_v46 = vrot.slane %v3352_v18, %v4934_v28 }
 0x163   : > { %v3857_v59 = vrot.slane %v3652_v6, %v5609_v33  ;;  %3777 = vperm.xlu1 %4381, %v3334_v24   ;;  %v3367_v10 = vrot.slane %v3353_v2, %v4934_v28  ;;  %v5640_v31 = vsub.s32 %v3867_v60, %v4911_v43  ;;  %v3874_v49 = vadd.s32 4294967248, %v5084_v13 }
 0x164   : > { %v3623_v44 = vcombine.low %v3615_v61, %v3622_v20  ;;  %v3632_v63 = vrot.slane %v3624_v3, %v4934_v28  ;;  %v3639_v0 = vrot.slane %v3625_v7, %v4934_v28  ;;  %v3881_v1 = vadd.s32 4294967240, %v5084_v13 }
 0x165   : > { %v3859_v53 = vsel %vm3858_vm3, %v3857_v59, %v3852_v27  ;;  %v3368_v38 = vcombine.low %v3360_v46, %v3367_v10  ;;  %v5648_v23 = vsub.s32 %v3874_v49, %v4911_v43  ;;  %v3888_v18 = vadd.s32 4294967232, %v5084_v13 }
 0x166   : > { %v3655_v52 = vpop.permute.xlu1 %3654  ;;  %3825 = vperm.xlu0 %4380, %v3606_v26   ;;  %v3640_v22 = vcombine.low %v3632_v63, %v3639_v0  ;;  %v5654_v8 = vsub.s32 %v3881_v1, %v4911_v43  ;;  %v3895_v16 = vadd.s32 4294967224, %v5084_v13  ;;  %v4468_v11 = vmov 0.0  }
 0x167   : > { %v3864_v39 = vrot.slane %v3655_v52, %v5630_v32  ;;  %v3670_v62 = vpop.permute.xlu0 %3669  ;;  %3780 = vperm.xlu1 %4381, %v3351_v57   ;;  %438 = vst [vmem:[#allocation2] sm:$0xf] %v4468_v11  ;;  %v5661_v17 = vsub.s32 %v3888_v18, %v4911_v43  ;;  %v3902_v30 = vadd.s32 4294967216, %v5084_v13  ;;  %v3909_v40 = vadd.s32 4294967208, %v5084_v13 }
 0x168   : > { %v5665_v51 = vsub.s32 %v3895_v16, %v4911_v43  ;;  %v3916_v34 = vadd.s32 4294967200, %v5084_v13  ;;  %v3923_v50 = vadd.s32 4294967192, %v5084_v13  ;;  %v3930_v3 = vadd.s32 4294967184, %v5084_v13 }
 0x169   : > { %v3866_v29 = vsel %vm3865_vm4, %v3864_v39, %v3859_v53  ;;  %v5671_v19 = vsub.s32 %v3902_v30, %v4911_v43  ;;  %v5675_v58 = vsub.s32 %v3909_v40, %v4911_v43  ;;  %v3937_v53 = vadd.s32 4294967176, %v5084_v13 }
 0x16a   : > { %v3658_v35 = vpop.permute.xlu1 %3657  ;;  %3828 = vperm.xlu0 %4380, %v3623_v44   ;;  %v3899_v2 = vrot.slane %v3670_v62, %v5665_v51  ;;  %v5685_v60 = vsub.s32 %v3916_v34, %v4911_v43  ;;  %v5688_v26 = vsub.s32 %v3923_v50, %v4911_v43  ;;  %v5697_v10 = vsub.s32 %v3930_v3, %v4911_v43 }
 0x16b   : > { %v3871_v36 = vrot.slane %v3658_v35, %v5640_v31  ;;  %3783 = vperm.xlu1 %4381, %v3368_v38   ;;  %v3676_v48 = vpop.permute.xlu0 %3675  ;;  %v5700_v39 = vsub.s32 %v3937_v53, %v4911_v43 }
 0x16c   : > { %v3913_v24 = vrot.slane %v3676_v48, %v5675_v58 }
 0x16d   : > { %v3873_v47 = vsel %vm3872_vm5, %v3871_v36, %v3866_v29 }
 0x16e   : > { %v3661_v56 = vpop.permute.xlu1 %3660  ;;  %3831 = vperm.xlu0 %4380, %v3640_v22  }
 0x16f   : > { %v3878_v55 = vrot.slane %v3661_v56, %v5648_v23  ;;  %v3682_v42 = vpop.permute.xlu0 %3681 }
 0x170   : > { %v3927_v46 = vrot.slane %v3682_v42, %v5688_v26 }
 0x171   : > { %v3880_v5 = vsel %vm3879_vm6, %v3878_v55, %v3873_v47 }
 0x172   : > { %v3664_v15 = vpop.permute.xlu1 %3663 }
 0x173   : > { %v3885_v4 = vrot.slane %v3664_v15, %v5654_v8  ;;  %v3688_v21 = vpop.permute.xlu0 %3687 }
 0x174   : > { %v3941_v29 = vrot.slane %v3688_v21, %v5700_v39 }
 0x175   : > { %v3887_v25 = vsel %vm3886_vm7, %v3885_v4, %v3880_v5 }
 0x176   : > { %v3667_v37 = vpop.permute.xlu1 %3666 }
 0x177   : > { %v3892_v12 = vrot.slane %v3667_v37, %v5661_v17  ;;  %v3694_v20 = vpop.permute.xlu0 %3693 }
 0x178   : > { %v3951_v43 = vrot.slane %v3694_v20, %v5572_v9 }
 0x179   : > { %v3894_v27 = vsel %vm3893_vm8, %v3892_v12, %v3887_v25 }
 0x17a   : > { %v3673_v54 = vpop.permute.xlu1 %3672  ;;  %v3901_v41 = vsel %vm3900_vm9, %v3899_v2, %v3894_v27 }
 0x17b   : > { %v3906_v6 = vrot.slane %v3673_v54, %v5671_v19  ;;  %v3700_v49 = vpop.permute.xlu0 %3699 }
 0x17c   : > { %v3961_v56 = vrot.slane %v3700_v49, %v5609_v33 }
 0x17d   : > { %v3908_v59 = vsel %vm3907_vm10, %v3906_v6, %v3901_v41 }
 0x17e   : > { %v3915_v61 = vsel %vm3914_vm11, %v3913_v24, %v3908_v59  ;;  %v3679_v7 = vpop.permute.xlu1 %3678 }
 0x17f   : > { %v3920_v57 = vrot.slane %v3679_v7, %v5685_v60  ;;  %v3706_v35 = vpop.permute.xlu0 %3705 }
 0x180   : > { %v3971_v11 = vrot.slane %v3706_v35, %v5640_v31 }
 0x181   : > { %v3922_v52 = vsel %vm3921_vm12, %v3920_v57, %v3915_v61 }
 0x182   : > { %v3929_v62 = vsel %vm3928_vm13, %v3927_v46, %v3922_v52  ;;  %v3685_v13 = vpop.permute.xlu1 %3684 }
 0x183   : > { %v3934_v44 = vrot.slane %v3685_v13, %v5697_v10  ;;  %v3712_v48 = vpop.permute.xlu0 %3711 }
 0x184   : > { %v3981_v25 = vrot.slane %v3712_v48, %v5654_v8 }
 0x185   : > { %v3936_v63 = vsel %vm3935_vm14, %v3934_v44, %v3929_v62 }
 0x186   : > { %v5707_v0 = vsel %vm3942_vm15, %v3941_v29, %v3936_v63 }
 0x187   : > { %v3718_v15 = vpop.permute.xlu0 %3717 }
 0x188   : > { %v3691_v38 = vpop.permute.xlu1 %3690  ;;  %v3991_v34 = vrot.slane %v3718_v15, %v5665_v51 }
 0x189   : > { %v3947_v36 = vrot.slane %v3691_v38, %v5566_v14 }
 0x18b   : > { %v3952_v1 = vsel %vm3844_vm1, %v3951_v43, %v3947_v36 }
 0x18d   : > { %v3724_v37 = vpop.permute.xlu0 %3723 }
 0x18e   : > { %v3697_v47 = vpop.permute.xlu1 %3696  ;;  %v4001_v59 = vrot.slane %v3724_v37, %v5675_v58 }
 0x18f   : > { %v3956_v22 = vrot.slane %v3697_v47, %v5590_v45 }
 0x191   : > { %v3957_v55 = vsel %vm3851_vm2, %v3956_v22, %v3952_v1 }
 0x192   : > { %v3962_v18 = vsel %vm3858_vm3, %v3961_v56, %v3957_v55  ;;  %v3730_v41 = vpop.permute.xlu0 %3729 }
 0x193   : > { %v3703_v16 = vpop.permute.xlu1 %3702  ;;  %v4011_v57 = vrot.slane %v3730_v41, %v5688_v26 }
 0x194   : > { %v3966_v5 = vrot.slane %v3703_v16, %v5630_v32 }
 0x196   : > { %v3967_v42 = vsel %vm3865_vm4, %v3966_v5, %v3962_v18 }
 0x197   : > { %v3972_v4 = vsel %vm3872_vm5, %v3971_v11, %v3967_v42  ;;  %v3736_v53 = vpop.permute.xlu0 %3735 }
 0x198   : > { %v3709_v30 = vpop.permute.xlu1 %3708  ;;  %v4021_v13 = vrot.slane %v3736_v53, %v5700_v39 }
 0x199   : > { %v3976_v40 = vrot.slane %v3709_v30, %v5648_v23 }
 0x19b   : > { %v3977_v12 = vsel %vm3879_vm6, %v3976_v40, %v3972_v4 }
 0x19c   : > { %v3715_v2 = vpop.permute.xlu1 %3714  ;;  %v3982_v21 = vsel %vm3886_vm7, %v3981_v25, %v3977_v12 }
 0x19d   : > { %v3986_v27 = vrot.slane %v3715_v2, %v5661_v17  ;;  %v3742_v44 = vpop.permute.xlu0 %3741 }
 0x19f   : > { %v3987_v50 = vsel %vm3893_vm8, %v3986_v27, %v3982_v21  ;;  %v4030_v21 = vrot.slane %v3742_v44, %v5572_v9 }
 0x1a0   : > { %v3992_v54 = vsel %vm3900_vm9, %v3991_v34, %v3987_v50 }
 0x1a1   : > { %v3721_v6 = vpop.permute.xlu1 %3720 }
 0x1a2   : > { %v3996_v24 = vrot.slane %v3721_v6, %v5671_v19  ;;  %v3748_v43 = vpop.permute.xlu0 %3747 }
 0x1a4   : > { %v3997_v61 = vsel %vm3907_vm10, %v3996_v24, %v3992_v54 }
 0x1a5   : > { %v4002_v20 = vsel %vm3914_vm11, %v4001_v59, %v3997_v61  ;;  %v4040_v61 = vrot.slane %v3748_v43, %v5609_v33 }
 0x1a6   : > { %v3727_v3 = vpop.permute.xlu1 %3726  ;;  %v3754_v1 = vpop.permute.xlu0 %3753 }
 0x1a7   : > { %v4006_v7 = vrot.slane %v3727_v3, %v5685_v60 }
 0x1a9   : > { %v4007_v46 = vsel %vm3921_vm12, %v4006_v7, %v4002_v20 }
 0x1aa   : > { %v3733_v52 = vpop.permute.xlu1 %3732  ;;  %v4012_v62 = vsel %vm3928_vm13, %v4011_v57, %v4007_v46 }
 0x1ab   : > { %v4016_v49 = vrot.slane %v3733_v52, %v5697_v10  ;;  %v4050_v52 = vrot.slane %v3754_v1, %v5640_v31 }
 0x1ad   : > { %v4017_v29 = vsel %vm3935_vm14, %v4016_v49, %v4012_v62 }
 0x1ae   : > { %v5740_v63 = vsel %vm3942_vm15, %v4021_v13, %v4017_v29  ;;  %v3739_v35 = vpop.permute.xlu1 %3738 }
 0x1af   : > { %v4026_v37 = vrot.slane %v3739_v35, %v5566_v14 }
 0x1b1   : > { %v4031_v41 = vsel %vm3844_vm1, %v4030_v21, %v4026_v37 }
 0x1b2   : > { %v3745_v38 = vpop.permute.xlu1 %3744 }
 0x1b3   : > { %v4035_v12 = vrot.slane %v3745_v38, %v5590_v45 }
 0x1b5   : > { %v4036_v6 = vsel %vm3851_vm2, %v4035_v12, %v4031_v41 }
 0x1b6   : > { %v3751_v36 = vpop.permute.xlu1 %3750 }
 0x1b7   : > { %v4045_v24 = vrot.slane %v3751_v36, %v5630_v32 }
 0x1ba   : > { %v3757_v47 = vpop.permute.xlu1 %3756 }
 0x1bb   : > { %v4055_v57 = vrot.slane %v3757_v47, %v5648_v23 }
 0x1bd   : > { %v3787_v48 = vpop.permute.xlu0 %3786 }
 0x1be   : > { %v3790_v22 = vpop.permute.xlu1 %3789  ;;  %v4105_v34 = vrot.slane %v3787_v48, %v5566_v14 }
 0x1bf   : > { %v4109_v27 = vrot.slane %v3790_v22, %v5572_v9 }
 0x1c1   : > { %v3793_v56 = vpop.permute.xlu0 %3792  ;;  %v4110_v20 = vsel %vm3844_vm1, %v4109_v27, %v4105_v34 }
 0x1c2   : > { %v3796_v55 = vpop.permute.xlu1 %3795  ;;  %v4114_v54 = vrot.slane %v3793_v56, %v5590_v45  ;;  %v4041_v45 = vsel %vm3858_vm3, %v4040_v61, %v4036_v6 }
 0x1c3   : > { %v4119_v3 = vrot.slane %v3796_v55, %v5609_v33  ;;  %v4046_v7 = vsel %vm3865_vm4, %v4045_v24, %v4041_v45 }
 0x1c4   : > { %v4115_v9 = vsel %vm3851_vm2, %v4114_v54, %v4110_v20  ;;  %v4051_v35 = vsel %vm3872_vm5, %v4050_v52, %v4046_v7 }
 0x1c5   : > { %v3799_v18 = vpop.permute.xlu0 %3798  ;;  %v4120_v49 = vsel %vm3858_vm3, %v4119_v3, %v4115_v9  ;;  %v4056_v36 = vsel %vm3879_vm6, %v4055_v57, %v4051_v35  ;;  %v439_v9 = vld [vmem:[#allocation2] sm:$0xf] }
 0x1c6   : > { %v3802_v16 = vpop.permute.xlu1 %3801  ;;  %v4124_v14 = vrot.slane %v3799_v18, %v5630_v32 }
 0x1c7   : > { %v4129_v62 = vrot.slane %v3802_v16, %v5640_v31 }
 0x1c8   : > { %v4125_v44 = vsel %vm3865_vm4, %v4124_v14, %v4120_v49 }
 0x1c9   : > { %v3805_v5 = vpop.permute.xlu0 %3804  ;;  %v4130_v22 = vsel %vm3872_vm5, %v4129_v62, %v4125_v44 }
 0x1ca   : > { %v3760_v11 = vpop.permute.xlu1 %3759  ;;  %v4134_v32 = vrot.slane %v3805_v5, %v5648_v23 }
 0x1cb   : > { %v4060_v33 = vrot.slane %v3760_v11, %v5654_v8 }
 0x1cd   : > { %v3808_v15 = vpop.permute.xlu0 %3807  ;;  %v4061_v48 = vsel %vm3886_vm7, %v4060_v33, %v4056_v36 }
 0x1ce   : > { %v3763_v42 = vpop.permute.xlu1 %3762  ;;  %v4139_v38 = vrot.slane %v3808_v15, %v5654_v8  ;;  %v4135_v8 = vsel %vm3879_vm6, %v4134_v32, %v4130_v22 }
 0x1cf   : > { %v4065_v29 = vrot.slane %v3763_v42, %v5661_v17 }
 0x1d0   : > { %v4140_v5 = vsel %vm3886_vm7, %v4139_v38, %v4135_v8 }
 0x1d1   : > { %v3811_v4 = vpop.permute.xlu0 %3810  ;;  %v4066_v18 = vsel %vm3893_vm8, %v4065_v29, %v4061_v48 }
 0x1d2   : > { %v3766_v30 = vpop.permute.xlu1 %3765  ;;  %v4144_v31 = vrot.slane %v3811_v4, %v5661_v17 }
 0x1d3   : > { %v4070_v43 = vrot.slane %v3766_v30, %v5665_v51 }
 0x1d5   : > { %v3814_v40 = vpop.permute.xlu0 %3813  ;;  %v4071_v11 = vsel %vm3900_vm9, %v4070_v43, %v4066_v18 }
 0x1d6   : > { %v3769_v25 = vpop.permute.xlu1 %3768  ;;  %v4149_v23 = vrot.slane %v3814_v40, %v5665_v51  ;;  %v4145_v51 = vsel %vm3893_vm8, %v4144_v31, %v4140_v5 }
 0x1d7   : > { %v4075_v1 = vrot.slane %v3769_v25, %v5671_v19 }
 0x1d9   : > { %v3817_v2 = vpop.permute.xlu0 %3816  ;;  %v4076_v4 = vsel %vm3907_vm10, %v4075_v1, %v4071_v11 }
 0x1da   : > { %v3772_v50 = vpop.permute.xlu1 %3771  ;;  %v4154_v16 = vrot.slane %v3817_v2, %v5671_v19  ;;  %v4150_v19 = vsel %vm3900_vm9, %v4149_v23, %v4145_v51 }
 0x1db   : > { %v4080_v56 = vrot.slane %v3772_v50, %v5675_v58 }
 0x1dd   : > { %v3820_v59 = vpop.permute.xlu0 %3819  ;;  %v4081_v37 = vsel %vm3914_vm11, %v4080_v56, %v4076_v4 }
 0x1de   : > { %v3775_v53 = vpop.permute.xlu1 %3774  ;;  %v4159_v15 = vrot.slane %v3820_v59, %v5675_v58  ;;  %v4155_v58 = vsel %vm3907_vm10, %v4154_v16, %v4150_v19 }
 0x1df   : > { %v4085_v17 = vrot.slane %v3775_v53, %v5685_v60 }
 0x1e1   : > { %v3823_v46 = vpop.permute.xlu0 %3822  ;;  %v4086_v21 = vsel %vm3921_vm12, %v4085_v17, %v4081_v37 }
 0x1e2   : > { %v3778_v13 = vpop.permute.xlu1 %3777  ;;  %v4164_v30 = vrot.slane %v3823_v46, %v5685_v60  ;;  %v4160_v60 = vsel %vm3914_vm11, %v4159_v15, %v4155_v58 }
 0x1e3   : > { %v4090_v42 = vrot.slane %v3778_v13, %v5688_v26 }
 0x1e4   : > { %v4165_v54 = vsel %vm3921_vm12, %v4164_v30, %v4160_v60 }
 0x1e5   : > { %v3826_v47 = vpop.permute.xlu0 %3825  ;;  %v4091_v50 = vsel %vm3928_vm13, %v4090_v42, %v4086_v21 }
 0x1e6   : > { %v3781_v55 = vpop.permute.xlu1 %3780  ;;  %v4169_v12 = vrot.slane %v3826_v47, %v5688_v26 }
 0x1e7   : > { %v4095_v40 = vrot.slane %v3781_v55, %v5697_v10 }
 0x1e8   : > { %v4170_v6 = vsel %vm3928_vm13, %v4169_v12, %v4165_v54 }
 0x1e9   : > { %v3829_v25 = vpop.permute.xlu0 %3828  ;;  %v4096_v41 = vsel %vm3935_vm14, %v4095_v40, %v4091_v50 }
 0x1ea   : > { %v3784_v2 = vpop.permute.xlu1 %3783  ;;  %v4174_v34 = vrot.slane %v3829_v25, %v5697_v10 }
 0x1eb   : > { %v4100_v27 = vrot.slane %v3784_v2, %v5700_v39 }
 0x1ec   : > { %v4175_v10 = vsel %vm3935_vm14, %v4174_v34, %v4170_v6 }
 0x1ed   : > { %v3832_v26 = vpop.permute.xlu0 %3831  ;;  %v4101_v24 = vsel %vm3942_vm15, %v4100_v27, %v4096_v41 }
 0x1ee   : > { %v4179_v59 = vrot.slane %v3832_v26, %v5700_v39  ;;  %v4182_v20 = vsel %vm4181_vm0, %v4101_v24, %v5707_v0 }
 0x1f0   : > { %v4180_v61 = vsel %vm3942_vm15, %v4179_v59, %v4175_v10 }
 0x1f1   : > { %v4183_v3 = vsel %vm4181_vm0, %v4180_v61, %v5740_v63 }
 0x1f2   : > { %v4184_v53 = vcombine.low %v4182_v20, %v4183_v3 }
 0x1f4   : > { %v4191_v14 = vrot.slane %v4184_v53, %v4934_v28 }
 0x1f6   : > { %v4193_v45 = vadd.f32 %v4191_v14, %v439_v9 }
 0x1f8   : > { %4194 = vst [vmem:[#allocation2] sm:$0xf] %v4193_v45 }
 0x1ff   : > { %v4198_v39 = vld [vmem:[#allocation2] sm:$0xf] }
 0x200   : > { %v4199_v7 = vmul.f32 0.0625, %v4198_v39 }
 0x202   : > { %4200 = vst [vmem:[%s430_s3] sm:$0xf] %v4199_v7 }
 0x203   : > { %4395 = shalt.err (!%p4392_p7)
}
 0x204   : > { %s4396_s22 = scalar_lea.hbm %s5812_s13, 64  ;;  %s4400_s25 = scalar_lea.hbm %s5861_s1, 512 }
 0x205   : > { %p4397_p8 = scmp.ne.s32.totalorder %s5812_s13, %s4396_s22  ;;  %p4401_p12 = scmp.lt.u32.totalorder %s5812_s13, %s5861_s1 }
 0x206   : > { %p4402_p13 = scmp.lt.u32.totalorder %s4400_s25, %s4396_s22  ;;  %p4404_p1 = scmp.lt.u32.totalorder %s4396_s22, %s5812_s13 }
 0x207   : > { %p4398_p10 = pnand %p4397_p8, %p4519_p5 }
 0x208   : > { %p4403_p0 = por %p4402_p13, %p4401_p12 }
 0x209   : > { %p4399_p11 = pneg %p4398_p10 }
 0x20a   : > { %p4405_p2 = por %p4404_p1, %p4403_p0 }
 0x20c   : > { %p4406_p3 = pnand %p4405_p2, %p4399_p11 }
 0x20e   : > { %4409 = shalt.err (!%p4406_p3)
}
 0x20f   : > { %4318 = dma.vmem_to_hbm [thread:$0]  (%p4519_p5), %s5814_s4, 64, %s5812_s13, %s4202_s15  }
 0x210 PF: > { %p4324_p4 = scmp.ge.s32.totalorder %s4460_s11, 2  ;;  %s4230_s28 = sand.u32 1, %s4440_s6  }
 0x211   : > { %s4231_s29 = scalar_lea.sflag [#allocation5], %s4230_s28 }
 0x212   : > { %p4321_p6 = pnand %p4324_p4, %p4530_p9 }
 0x214   : > { %4435 = dma.done.wait (!%p4321_p6), %s4231_s29, 64  }
 0x215   : > { %4437 = vsyncadd (!%p4321_p6), %s4231_s29, 4294967232  ;;  %s14_s11 = sadd.s32 1, %s4460_s11   ;;  %s5864_s6 = smov %s4444_s7 }
 0x216   : > { %p11_p7 = scmp.ge.s32.totalorder %s14_s11, 10   ;;  %s5865_s7 = smov %s4448_s8 }
 0x217   : > { %s5866_s8 = smov %s4528_s18  ;;  %s5867_s9 = smov %s4456_s10 }
 0x218   : > { %s5868_s10 = smov %s5870_s14  ;;  %13 = sbr.rel (!%p11_p7) target bundleno = 4 (0x4), region = 110 }
 0x21f   :  { %4236 = vsyncpa [#allocation5], 1 }
 0x220   :  { %4238 = vsyncpa [#allocation5 + $0x1], 1 }

</bundles_post_ra>
